<compile_context>
chip_gen: v7x
topology: tpu7x:2x2x1
jax: 0.10.0
libtpu: 0.0.40
codegen_flags: <defaults>
</compile_context>

<pallas_src>
import jax
import jax.numpy as jnp
from jax import lax
from jax.experimental import pallas as pl
from jax.experimental.pallas import tpu as pltpu

# ---- static model dimensions -------------------------------------------------
K = 5                  # conv kernel size
L0 = 178               # input length (yields exactly 32*18 flattened features)
C1, C2, C3 = 6, 16, 32
L1 = L0 - (K - 1)      # 174  (after conv1)
P1 = L1 // 2           # 87   (after pool1)
L2 = P1 - (K - 1)      # 83   (after conv2)
P2 = L2 // 2           # 41   (after pool2)
L3 = P2 - (K - 1)      # 37   (after conv3)
P3 = L3 // 2           # 18   (after pool3)
FEAT = C3 * P3         # 576
HID = 128
OUT = 5


def _maxpool2(h):
    """MaxPool1d(kernel=2, stride=2) along the lane (last) axis.

    Implemented as two exact 0/1-selection matmuls + max so no stride-2 lane
    slicing or lane-crossing reshape is needed."""
    l_in = h.shape[-1]
    l_out = l_in // 2
    rows = lax.broadcasted_iota(jnp.int32, (l_in, l_out), 0)
    cols = lax.broadcasted_iota(jnp.int32, (l_in, l_out), 1)
    s_even = jnp.where(rows == 2 * cols, 1.0, 0.0).astype(h.dtype)
    s_odd = jnp.where(rows == 2 * cols + 1, 1.0, 0.0).astype(h.dtype)
    return jnp.maximum(
        jnp.dot(h, s_even, preferred_element_type=jnp.float32),
        jnp.dot(h, s_odd, preferred_element_type=jnp.float32))


def mycnn_kernel(x_ref, w1_ref, b1_ref, w2_ref, b2_ref, w3_ref, b3_ref,
                 wfc1_ref, bfc1_ref, wfc2_ref, bfc2_ref, o_ref):
    x = x_ref[0]                                       # (1, L0)  one batch sample

    # ---- Conv1d(1 -> 6, k=5) + ReLU + MaxPool(2): VPU broadcast (no K=1 MXU pushes)
    w1 = w1_ref[...]                                   # (6, K)
    acc1 = jnp.zeros((C1, L1), jnp.float32)
    for k in range(K):
        acc1 = acc1 + w1[:, k:k + 1] * x[:, k:k + L1]
    a1 = _maxpool2(jnp.maximum(acc1 + b1_ref[...], 0.0))          # (6, P1)

    # ---- Conv1d(6 -> 16, k=5) + ReLU + MaxPool(2): unrolled tap-sum matmuls
    acc2 = jnp.zeros((C2, L2), jnp.float32)
    for k in range(K):
        acc2 = acc2 + jnp.dot(w2_ref[k], a1[:, k:k + L2],
                              preferred_element_type=jnp.float32)
    a2 = _maxpool2(jnp.maximum(acc2 + b2_ref[...], 0.0))          # (16, P2)

    # ---- Conv1d(16 -> 32, k=5) + ReLU + MaxPool(2)
    acc3 = jnp.zeros((C3, L3), jnp.float32)
    for k in range(K):
        acc3 = acc3 + jnp.dot(w3_ref[k], a2[:, k:k + L3],
                              preferred_element_type=jnp.float32)
    a3 = _maxpool2(jnp.maximum(acc3 + b3_ref[...], 0.0))          # (32, P3)

    # ---- view(-1, 32*18) + Linear(576 -> 128), without an explicit reshape:
    # wfc1[c] == W_fc1[:, c*18:(c+1)*18].T, so summing per-channel matmuls is exactly
    # the flattened (c-major) contraction PyTorch performs.
    h = bfc1_ref[...]                                             # (1, HID)
    for c in range(C3):
        h = h + jnp.dot(a3[c:c + 1, :], wfc1_ref[c],
                        preferred_element_type=jnp.float32)
    # Dropout(p=0.3) is identity at inference (eval mode).
    h = jnp.maximum(h, 0.0)

    # ---- Linear(128 -> 5)
    out = jnp.dot(h, wfc2_ref[...], preferred_element_type=jnp.float32) + bfc2_ref[...]
    o_ref[0] = out.astype(o_ref.dtype)                            # (1, OUT)


def _resident_spec(a):
    """Whole-array block, same block every grid step (stays VMEM-resident)."""
    nd = a.ndim
    return pl.BlockSpec(a.shape, lambda b: (0,) * nd)


def mycnn_forward(x, params):
    """x: (B, 1, L0) float32 -> (B, 5) float32 (inference forward of MyCNN)."""
    B = x.shape[0]
    x = x.astype(jnp.float32)

    weights = (params["w1"], params["b1"], params["w2"], params["b2"],
               params["w3"], params["b3"], params["wfc1"], params["bfc1"],
               params["wfc2"], params["bfc2"])

    out3d = pl.pallas_call(
        mycnn_kernel,
        out_shape=jax.ShapeDtypeStruct((B, 1, OUT), jnp.float32),
        grid=(B,),
        in_specs=[pl.BlockSpec((1, 1, L0), lambda b: (b, 0, 0))] +
                 [_resident_spec(a) for a in weights],
        out_specs=pl.BlockSpec((1, 1, OUT), lambda b: (b, 0, 0)),
        compiler_params=pltpu.CompilerParams(
            dimension_semantics=("parallel",),        # shard batch across TCs on v7x
            vmem_limit_bytes=8 * 1024 * 1024),        # actual working set is < 1 MiB
    )(x, *weights)
    return out3d.reshape(B, OUT)


mycnn_forward_jit = jax.jit(mycnn_forward)


def init_params(key):
    """Deterministic params with PyTorch shapes, repacked into kernel-friendly layouts."""
    ks = jax.random.split(key, 10)

    def u(k, shape, fan_in):
        bound = 1.0 / jnp.sqrt(jnp.float32(fan_in))
        return jax.random.uniform(k, shape, jnp.float32, -bound, bound)

    w_conv1 = u(ks[0], (C1, 1, K), 1 * K)       # PyTorch Conv1d(1,6,5).weight
    b_conv1 = u(ks[1], (C1,), 1 * K)
    w_conv2 = u(ks[2], (C2, C1, K), C1 * K)     # Conv1d(6,16,5)
    b_conv2 = u(ks[3], (C2,), C1 * K)
    w_conv3 = u(ks[4], (C3, C2, K), C2 * K)     # Conv1d(16,32,5)
    b_conv3 = u(ks[5], (C3,), C2 * K)
    w_fc1 = u(ks[6], (HID, FEAT), FEAT)         # Linear(576,128)
    b_fc1 = u(ks[7], (HID,), FEAT)
    w_fc2 = u(ks[8], (OUT, HID), HID)           # Linear(128,5)
    b_fc2 = u(ks[9], (OUT,), HID)

    return dict(
        w1=w_conv1[:, 0, :],                                     # (6, K)
        b1=b_conv1.reshape(C1, 1),
        w2=jnp.transpose(w_conv2, (2, 0, 1)),                    # (K, 16, 6)
        b2=b_conv2.reshape(C2, 1),
        w3=jnp.transpose(w_conv3, (2, 0, 1)),                    # (K, 32, 16)
        b3=b_conv3.reshape(C3, 1),
        wfc1=jnp.transpose(w_fc1.reshape(HID, C3, P3), (1, 2, 0)),  # (32, 18, 128)
        bfc1=b_fc1.reshape(1, HID),
        wfc2=w_fc2.T,                                            # (128, 5)
        bfc2=b_fc2.reshape(1, OUT),
    )


def mycnn_reference(x, p):
    """Pure-JAX reference of the same forward pass (sanity check only)."""
    B = x.shape[0]

    def conv_relu_pool(h, w_t, b_col):
        # h: (B, Cin, L); w_t: (K, Cout, Cin); b_col: (Cout, 1)
        k_sz = w_t.shape[0]
        l_out = h.shape[-1] - (k_sz - 1)
        out = sum(jnp.einsum("oc,bcl->bol", w_t[k], h[:, :, k:k + l_out])
                  for k in range(k_sz))
        out = jnp.maximum(out + b_col[None], 0.0)
        p_out = out.shape[-1] // 2
        return jnp.maximum(out[..., 0:2 * p_out:2], out[..., 1:2 * p_out:2])

    w1_t = jnp.transpose(p["w1"], (1, 0))[:, :, None]            # (K, 6, 1)
    h = conv_relu_pool(x.astype(jnp.float32), w1_t, p["b1"])     # (B, 6, P1)
    h = conv_relu_pool(h, p["w2"], p["b2"])                      # (B, 16, P2)
    h = conv_relu_pool(h, p["w3"], p["b3"])                      # (B, 32, P3)
    flat = h.reshape(B, FEAT)
    w_fc1 = jnp.transpose(p["wfc1"], (2, 0, 1)).reshape(HID, FEAT)
    z = jnp.maximum(flat @ w_fc1.T + p["bfc1"], 0.0)             # dropout: identity
    return z @ p["wfc2"] + p["bfc2"]


if __name__ == "__main__":
    B = 2
    x = jax.random.normal(jax.random.PRNGKey(0), (B, 1, L0), dtype=jnp.float32)
    params = init_params(jax.random.PRNGKey(42))

    out = mycnn_forward_jit(x, params)
    out = jax.block_until_ready(out)
    assert out.shape == (B, OUT) and out.dtype == jnp.float32

    ref = mycnn_reference(x, params)
    assert jnp.allclose(out, ref, rtol=2e-2, atol=2e-2), (out, ref)

    print("KERNEL_OK")
</pallas_src>

<mosaic_0001>
module attributes {stable_mosaic.version = 11 : i64} {
  func.func @mycnn_kernel(%arg0: i32, %arg1: memref<1x1x178xf32, #tpu.memory_space<vmem>>, %arg2: memref<6x5xf32, #tpu.memory_space<vmem>>, %arg3: memref<6x1xf32, #tpu.memory_space<vmem>>, %arg4: memref<5x16x6xf32, #tpu.memory_space<vmem>>, %arg5: memref<16x1xf32, #tpu.memory_space<vmem>>, %arg6: memref<5x32x16xf32, #tpu.memory_space<vmem>>, %arg7: memref<32x1xf32, #tpu.memory_space<vmem>>, %arg8: memref<32x18x128xf32, #tpu.memory_space<vmem>>, %arg9: memref<1x128xf32, #tpu.memory_space<vmem>>, %arg10: memref<128x5xf32, #tpu.memory_space<vmem>>, %arg11: memref<1x5xf32, #tpu.memory_space<vmem>>, %arg12: memref<1x1x5xf32, #tpu.memory_space<vmem>>) attributes {dimension_semantics = [#tpu.dimension_semantics<parallel>], iteration_bounds = array<i64: 2>, scalar_prefetch = 0 : i64, scratch_operands = 0 : i64, tpu.core_type = #tpu.core_type<tc>, window_params = [{transform_indices = @transform_0, window_bounds = array<i64: 1, 1, 178>}, {pipeline_mode = #tpu.pipeline_mode<synchronous>, transform_indices = @transform_1, window_bounds = array<i64: 6, 5>}, {pipeline_mode = #tpu.pipeline_mode<synchronous>, transform_indices = @transform_2, window_bounds = array<i64: 6, 1>}, {pipeline_mode = #tpu.pipeline_mode<synchronous>, transform_indices = @transform_3, window_bounds = array<i64: 5, 16, 6>}, {pipeline_mode = #tpu.pipeline_mode<synchronous>, transform_indices = @transform_4, window_bounds = array<i64: 16, 1>}, {pipeline_mode = #tpu.pipeline_mode<synchronous>, transform_indices = @transform_5, window_bounds = array<i64: 5, 32, 16>}, {pipeline_mode = #tpu.pipeline_mode<synchronous>, transform_indices = @transform_6, window_bounds = array<i64: 32, 1>}, {pipeline_mode = #tpu.pipeline_mode<synchronous>, transform_indices = @transform_7, window_bounds = array<i64: 32, 18, 128>}, {pipeline_mode = #tpu.pipeline_mode<synchronous>, transform_indices = @transform_8, window_bounds = array<i64: 1, 128>}, {pipeline_mode = #tpu.pipeline_mode<synchronous>, transform_indices = @transform_9, window_bounds = array<i64: 128, 5>}, {pipeline_mode = #tpu.pipeline_mode<synchronous>, transform_indices = @transform_10, window_bounds = array<i64: 1, 5>}, {transform_indices = @transform_11, window_bounds = array<i64: 1, 1, 5>}]} {
    %c0 = arith.constant 0 : index
    %c0_0 = arith.constant 0 : index
    %c0_1 = arith.constant 0 : index
    %0 = vector.load %arg1[%c0, %c0_0, %c0_1] : memref<1x1x178xf32, #tpu.memory_space<vmem>>, vector<1x1x178xf32>
    %1 = vector.shape_cast %0 : vector<1x1x178xf32> to vector<1x178xf32>
    %c0_2 = arith.constant 0 : index
    %c0_3 = arith.constant 0 : index
    %2 = vector.load %arg2[%c0_2, %c0_3] : memref<6x5xf32, #tpu.memory_space<vmem>>, vector<6x5xf32>
    %cst = arith.constant 0.000000e+00 : f32
    %3 = vector.broadcast %cst : f32 to vector<6x174xf32>
    %4 = vector.extract_strided_slice %2 {offsets = [0, 0], sizes = [6, 1], strides = [1, 1]} : vector<6x5xf32> to vector<6x1xf32>
    %5 = vector.extract_strided_slice %1 {offsets = [0, 0], sizes = [1, 174], strides = [1, 1]} : vector<1x178xf32> to vector<1x174xf32>
    %6 = vector.broadcast %4 : vector<6x1xf32> to vector<6x174xf32>
    %7 = vector.broadcast %5 : vector<1x174xf32> to vector<6x174xf32>
    %8 = arith.mulf %6, %7 : vector<6x174xf32>
    %9 = arith.addf %3, %8 : vector<6x174xf32>
    %10 = vector.extract_strided_slice %2 {offsets = [0, 1], sizes = [6, 1], strides = [1, 1]} : vector<6x5xf32> to vector<6x1xf32>
    %11 = vector.extract_strided_slice %1 {offsets = [0, 1], sizes = [1, 174], strides = [1, 1]} : vector<1x178xf32> to vector<1x174xf32>
    %12 = vector.broadcast %10 : vector<6x1xf32> to vector<6x174xf32>
    %13 = vector.broadcast %11 : vector<1x174xf32> to vector<6x174xf32>
    %14 = arith.mulf %12, %13 : vector<6x174xf32>
    %15 = arith.addf %9, %14 : vector<6x174xf32>
    %16 = vector.extract_strided_slice %2 {offsets = [0, 2], sizes = [6, 1], strides = [1, 1]} : vector<6x5xf32> to vector<6x1xf32>
    %17 = vector.extract_strided_slice %1 {offsets = [0, 2], sizes = [1, 174], strides = [1, 1]} : vector<1x178xf32> to vector<1x174xf32>
    %18 = vector.broadcast %16 : vector<6x1xf32> to vector<6x174xf32>
    %19 = vector.broadcast %17 : vector<1x174xf32> to vector<6x174xf32>
    %20 = arith.mulf %18, %19 : vector<6x174xf32>
    %21 = arith.addf %15, %20 : vector<6x174xf32>
    %22 = vector.extract_strided_slice %2 {offsets = [0, 3], sizes = [6, 1], strides = [1, 1]} : vector<6x5xf32> to vector<6x1xf32>
    %23 = vector.extract_strided_slice %1 {offsets = [0, 3], sizes = [1, 174], strides = [1, 1]} : vector<1x178xf32> to vector<1x174xf32>
    %24 = vector.broadcast %22 : vector<6x1xf32> to vector<6x174xf32>
    %25 = vector.broadcast %23 : vector<1x174xf32> to vector<6x174xf32>
    %26 = arith.mulf %24, %25 : vector<6x174xf32>
    %27 = arith.addf %21, %26 : vector<6x174xf32>
    %28 = vector.extract_strided_slice %2 {offsets = [0, 4], sizes = [6, 1], strides = [1, 1]} : vector<6x5xf32> to vector<6x1xf32>
    %29 = vector.extract_strided_slice %1 {offsets = [0, 4], sizes = [1, 174], strides = [1, 1]} : vector<1x178xf32> to vector<1x174xf32>
    %30 = vector.broadcast %28 : vector<6x1xf32> to vector<6x174xf32>
    %31 = vector.broadcast %29 : vector<1x174xf32> to vector<6x174xf32>
    %32 = arith.mulf %30, %31 : vector<6x174xf32>
    %33 = arith.addf %27, %32 : vector<6x174xf32>
    %c0_4 = arith.constant 0 : index
    %c0_5 = arith.constant 0 : index
    %34 = vector.load %arg3[%c0_4, %c0_5] : memref<6x1xf32, #tpu.memory_space<vmem>>, vector<6x1xf32>
    %35 = vector.broadcast %34 : vector<6x1xf32> to vector<6x174xf32>
    %36 = arith.addf %33, %35 : vector<6x174xf32>
    %cst_6 = arith.constant 0.000000e+00 : f32
    %37 = vector.broadcast %cst_6 : f32 to vector<6x174xf32>
    %38 = arith.maximumf %36, %37 : vector<6x174xf32>
    %39 = tpu.iota {dimensions = array<i32: 0>} : vector<174x87xi32>
    %40 = tpu.iota {dimensions = array<i32: 1>} : vector<174x87xi32>
    %c2_i32 = arith.constant 2 : i32
    %41 = vector.broadcast %c2_i32 : i32 to vector<174x87xi32>
    %42 = arith.muli %41, %40 : vector<174x87xi32>
    %43 = arith.cmpi eq, %39, %42 : vector<174x87xi32>
    %cst_7 = arith.constant 1.000000e+00 : f32
    %cst_8 = arith.constant 0.000000e+00 : f32
    %44 = vector.broadcast %cst_7 : f32 to vector<174x87xf32>
    %45 = vector.broadcast %cst_8 : f32 to vector<174x87xf32>
    %46 = arith.select %43, %44, %45 : vector<174x87xi1>, vector<174x87xf32>
    %c2_i32_9 = arith.constant 2 : i32
    %47 = vector.broadcast %c2_i32_9 : i32 to vector<174x87xi32>
    %48 = arith.muli %47, %40 : vector<174x87xi32>
    %c1_i32 = arith.constant 1 : i32
    %49 = vector.broadcast %c1_i32 : i32 to vector<174x87xi32>
    %50 = arith.addi %48, %49 : vector<174x87xi32>
    %51 = arith.cmpi eq, %39, %50 : vector<174x87xi32>
    %cst_10 = arith.constant 1.000000e+00 : f32
    %cst_11 = arith.constant 0.000000e+00 : f32
    %52 = vector.broadcast %cst_10 : f32 to vector<174x87xf32>
    %53 = vector.broadcast %cst_11 : f32 to vector<174x87xf32>
    %54 = arith.select %51, %52, %53 : vector<174x87xi1>, vector<174x87xf32>
    %cst_12 = arith.constant dense<0.000000e+00> : vector<6x87xf32>
    %55 = tpu.matmul %38, %46, %cst_12 {dimension_numbers = #tpu.dot_dimension_numbers<[1], [0], [0], [1], [0, 0, 1, 1], [], []>} : vector<6x174xf32>, vector<174x87xf32>, vector<6x87xf32> -> vector<6x87xf32>
    %cst_13 = arith.constant dense<0.000000e+00> : vector<6x87xf32>
    %56 = tpu.matmul %38, %54, %cst_13 {dimension_numbers = #tpu.dot_dimension_numbers<[1], [0], [0], [1], [0, 0, 1, 1], [], []>} : vector<6x174xf32>, vector<174x87xf32>, vector<6x87xf32> -> vector<6x87xf32>
    %57 = arith.maximumf %55, %56 : vector<6x87xf32>
    %cst_14 = arith.constant 0.000000e+00 : f32
    %58 = vector.broadcast %cst_14 : f32 to vector<16x83xf32>
    %c0_15 = arith.constant 0 : index
    %c0_16 = arith.constant 0 : index
    %c0_17 = arith.constant 0 : index
    %59 = vector.load %arg4[%c0_15, %c0_16, %c0_17] : memref<5x16x6xf32, #tpu.memory_space<vmem>>, vector<1x16x6xf32>
    %60 = vector.shape_cast %59 : vector<1x16x6xf32> to vector<16x6xf32>
    %61 = vector.extract_strided_slice %57 {offsets = [0, 0], sizes = [6, 83], strides = [1, 1]} : vector<6x87xf32> to vector<6x83xf32>
    %cst_18 = arith.constant dense<0.000000e+00> : vector<16x83xf32>
    %62 = tpu.matmul %60, %61, %cst_18 {dimension_numbers = #tpu.dot_dimension_numbers<[1], [0], [0], [1], [0, 0, 1, 1], [], []>} : vector<16x6xf32>, vector<6x83xf32>, vector<16x83xf32> -> vector<16x83xf32>
    %63 = arith.addf %58, %62 : vector<16x83xf32>
    %c1 = arith.constant 1 : index
    %c0_19 = arith.constant 0 : index
    %c0_20 = arith.constant 0 : index
    %64 = vector.load %arg4[%c1, %c0_19, %c0_20] : memref<5x16x6xf32, #tpu.memory_space<vmem>>, vector<1x16x6xf32>
    %65 = vector.shape_cast %64 : vector<1x16x6xf32> to vector<16x6xf32>
    %66 = vector.extract_strided_slice %57 {offsets = [0, 1], sizes = [6, 83], strides = [1, 1]} : vector<6x87xf32> to vector<6x83xf32>
    %cst_21 = arith.constant dense<0.000000e+00> : vector<16x83xf32>
    %67 = tpu.matmul %65, %66, %cst_21 {dimension_numbers = #tpu.dot_dimension_numbers<[1], [0], [0], [1], [0, 0, 1, 1], [], []>} : vector<16x6xf32>, vector<6x83xf32>, vector<16x83xf32> -> vector<16x83xf32>
    %68 = arith.addf %63, %67 : vector<16x83xf32>
    %c2 = arith.constant 2 : index
    %c0_22 = arith.constant 0 : index
    %c0_23 = arith.constant 0 : index
    %69 = vector.load %arg4[%c2, %c0_22, %c0_23] : memref<5x16x6xf32, #tpu.memory_space<vmem>>, vector<1x16x6xf32>
    %70 = vector.shape_cast %69 : vector<1x16x6xf32> to vector<16x6xf32>
    %71 = vector.extract_strided_slice %57 {offsets = [0, 2], sizes = [6, 83], strides = [1, 1]} : vector<6x87xf32> to vector<6x83xf32>
    %cst_24 = arith.constant dense<0.000000e+00> : vector<16x83xf32>
    %72 = tpu.matmul %70, %71, %cst_24 {dimension_numbers = #tpu.dot_dimension_numbers<[1], [0], [0], [1], [0, 0, 1, 1], [], []>} : vector<16x6xf32>, vector<6x83xf32>, vector<16x83xf32> -> vector<16x83xf32>
    %73 = arith.addf %68, %72 : vector<16x83xf32>
    %c3 = arith.constant 3 : index
    %c0_25 = arith.constant 0 : index
    %c0_26 = arith.constant 0 : index
    %74 = vector.load %arg4[%c3, %c0_25, %c0_26] : memref<5x16x6xf32, #tpu.memory_space<vmem>>, vector<1x16x6xf32>
    %75 = vector.shape_cast %74 : vector<1x16x6xf32> to vector<16x6xf32>
    %76 = vector.extract_strided_slice %57 {offsets = [0, 3], sizes = [6, 83], strides = [1, 1]} : vector<6x87xf32> to vector<6x83xf32>
    %cst_27 = arith.constant dense<0.000000e+00> : vector<16x83xf32>
    %77 = tpu.matmul %75, %76, %cst_27 {dimension_numbers = #tpu.dot_dimension_numbers<[1], [0], [0], [1], [0, 0, 1, 1], [], []>} : vector<16x6xf32>, vector<6x83xf32>, vector<16x83xf32> -> vector<16x83xf32>
    %78 = arith.addf %73, %77 : vector<16x83xf32>
    %c4 = arith.constant 4 : index
    %c0_28 = arith.constant 0 : index
    %c0_29 = arith.constant 0 : index
    %79 = vector.load %arg4[%c4, %c0_28, %c0_29] : memref<5x16x6xf32, #tpu.memory_space<vmem>>, vector<1x16x6xf32>
    %80 = vector.shape_cast %79 : vector<1x16x6xf32> to vector<16x6xf32>
    %81 = vector.extract_strided_slice %57 {offsets = [0, 4], sizes = [6, 83], strides = [1, 1]} : vector<6x87xf32> to vector<6x83xf32>
    %cst_30 = arith.constant dense<0.000000e+00> : vector<16x83xf32>
    %82 = tpu.matmul %80, %81, %cst_30 {dimension_numbers = #tpu.dot_dimension_numbers<[1], [0], [0], [1], [0, 0, 1, 1], [], []>} : vector<16x6xf32>, vector<6x83xf32>, vector<16x83xf32> -> vector<16x83xf32>
    %83 = arith.addf %78, %82 : vector<16x83xf32>
    %c0_31 = arith.constant 0 : index
    %c0_32 = arith.constant 0 : index
    %84 = vector.load %arg5[%c0_31, %c0_32] : memref<16x1xf32, #tpu.memory_space<vmem>>, vector<16x1xf32>
    %85 = vector.broadcast %84 : vector<16x1xf32> to vector<16x83xf32>
    %86 = arith.addf %83, %85 : vector<16x83xf32>
    %cst_33 = arith.constant 0.000000e+00 : f32
    %87 = vector.broadcast %cst_33 : f32 to vector<16x83xf32>
    %88 = arith.maximumf %86, %87 : vector<16x83xf32>
    %89 = tpu.iota {dimensions = array<i32: 0>} : vector<83x41xi32>
    %90 = tpu.iota {dimensions = array<i32: 1>} : vector<83x41xi32>
    %c2_i32_34 = arith.constant 2 : i32
    %91 = vector.broadcast %c2_i32_34 : i32 to vector<83x41xi32>
    %92 = arith.muli %91, %90 : vector<83x41xi32>
    %93 = arith.cmpi eq, %89, %92 : vector<83x41xi32>
    %cst_35 = arith.constant 1.000000e+00 : f32
    %cst_36 = arith.constant 0.000000e+00 : f32
    %94 = vector.broadcast %cst_35 : f32 to vector<83x41xf32>
    %95 = vector.broadcast %cst_36 : f32 to vector<83x41xf32>
    %96 = arith.select %93, %94, %95 : vector<83x41xi1>, vector<83x41xf32>
    %c2_i32_37 = arith.constant 2 : i32
    %97 = vector.broadcast %c2_i32_37 : i32 to vector<83x41xi32>
    %98 = arith.muli %97, %90 : vector<83x41xi32>
    %c1_i32_38 = arith.constant 1 : i32
    %99 = vector.broadcast %c1_i32_38 : i32 to vector<83x41xi32>
    %100 = arith.addi %98, %99 : vector<83x41xi32>
    %101 = arith.cmpi eq, %89, %100 : vector<83x41xi32>
    %cst_39 = arith.constant 1.000000e+00 : f32
    %cst_40 = arith.constant 0.000000e+00 : f32
    %102 = vector.broadcast %cst_39 : f32 to vector<83x41xf32>
    %103 = vector.broadcast %cst_40 : f32 to vector<83x41xf32>
    %104 = arith.select %101, %102, %103 : vector<83x41xi1>, vector<83x41xf32>
    %cst_41 = arith.constant dense<0.000000e+00> : vector<16x41xf32>
    %105 = tpu.matmul %88, %96, %cst_41 {dimension_numbers = #tpu.dot_dimension_numbers<[1], [0], [0], [1], [0, 0, 1, 1], [], []>} : vector<16x83xf32>, vector<83x41xf32>, vector<16x41xf32> -> vector<16x41xf32>
    %cst_42 = arith.constant dense<0.000000e+00> : vector<16x41xf32>
    %106 = tpu.matmul %88, %104, %cst_42 {dimension_numbers = #tpu.dot_dimension_numbers<[1], [0], [0], [1], [0, 0, 1, 1], [], []>} : vector<16x83xf32>, vector<83x41xf32>, vector<16x41xf32> -> vector<16x41xf32>
    %107 = arith.maximumf %105, %106 : vector<16x41xf32>
    %cst_43 = arith.constant 0.000000e+00 : f32
    %108 = vector.broadcast %cst_43 : f32 to vector<32x37xf32>
    %c0_44 = arith.constant 0 : index
    %c0_45 = arith.constant 0 : index
    %c0_46 = arith.constant 0 : index
    %109 = vector.load %arg6[%c0_44, %c0_45, %c0_46] : memref<5x32x16xf32, #tpu.memory_space<vmem>>, vector<1x32x16xf32>
    %110 = vector.shape_cast %109 : vector<1x32x16xf32> to vector<32x16xf32>
    %111 = vector.extract_strided_slice %107 {offsets = [0, 0], sizes = [16, 37], strides = [1, 1]} : vector<16x41xf32> to vector<16x37xf32>
    %cst_47 = arith.constant dense<0.000000e+00> : vector<32x37xf32>
    %112 = tpu.matmul %110, %111, %cst_47 {dimension_numbers = #tpu.dot_dimension_numbers<[1], [0], [0], [1], [0, 0, 1, 1], [], []>} : vector<32x16xf32>, vector<16x37xf32>, vector<32x37xf32> -> vector<32x37xf32>
    %113 = arith.addf %108, %112 : vector<32x37xf32>
    %c1_48 = arith.constant 1 : index
    %c0_49 = arith.constant 0 : index
    %c0_50 = arith.constant 0 : index
    %114 = vector.load %arg6[%c1_48, %c0_49, %c0_50] : memref<5x32x16xf32, #tpu.memory_space<vmem>>, vector<1x32x16xf32>
    %115 = vector.shape_cast %114 : vector<1x32x16xf32> to vector<32x16xf32>
    %116 = vector.extract_strided_slice %107 {offsets = [0, 1], sizes = [16, 37], strides = [1, 1]} : vector<16x41xf32> to vector<16x37xf32>
    %cst_51 = arith.constant dense<0.000000e+00> : vector<32x37xf32>
    %117 = tpu.matmul %115, %116, %cst_51 {dimension_numbers = #tpu.dot_dimension_numbers<[1], [0], [0], [1], [0, 0, 1, 1], [], []>} : vector<32x16xf32>, vector<16x37xf32>, vector<32x37xf32> -> vector<32x37xf32>
    %118 = arith.addf %113, %117 : vector<32x37xf32>
    %c2_52 = arith.constant 2 : index
    %c0_53 = arith.constant 0 : index
    %c0_54 = arith.constant 0 : index
    %119 = vector.load %arg6[%c2_52, %c0_53, %c0_54] : memref<5x32x16xf32, #tpu.memory_space<vmem>>, vector<1x32x16xf32>
    %120 = vector.shape_cast %119 : vector<1x32x16xf32> to vector<32x16xf32>
    %121 = vector.extract_strided_slice %107 {offsets = [0, 2], sizes = [16, 37], strides = [1, 1]} : vector<16x41xf32> to vector<16x37xf32>
    %cst_55 = arith.constant dense<0.000000e+00> : vector<32x37xf32>
    %122 = tpu.matmul %120, %121, %cst_55 {dimension_numbers = #tpu.dot_dimension_numbers<[1], [0], [0], [1], [0, 0, 1, 1], [], []>} : vector<32x16xf32>, vector<16x37xf32>, vector<32x37xf32> -> vector<32x37xf32>
    %123 = arith.addf %118, %122 : vector<32x37xf32>
    %c3_56 = arith.constant 3 : index
    %c0_57 = arith.constant 0 : index
    %c0_58 = arith.constant 0 : index
    %124 = vector.load %arg6[%c3_56, %c0_57, %c0_58] : memref<5x32x16xf32, #tpu.memory_space<vmem>>, vector<1x32x16xf32>
    %125 = vector.shape_cast %124 : vector<1x32x16xf32> to vector<32x16xf32>
    %126 = vector.extract_strided_slice %107 {offsets = [0, 3], sizes = [16, 37], strides = [1, 1]} : vector<16x41xf32> to vector<16x37xf32>
    %cst_59 = arith.constant dense<0.000000e+00> : vector<32x37xf32>
    %127 = tpu.matmul %125, %126, %cst_59 {dimension_numbers = #tpu.dot_dimension_numbers<[1], [0], [0], [1], [0, 0, 1, 1], [], []>} : vector<32x16xf32>, vector<16x37xf32>, vector<32x37xf32> -> vector<32x37xf32>
    %128 = arith.addf %123, %127 : vector<32x37xf32>
    %c4_60 = arith.constant 4 : index
    %c0_61 = arith.constant 0 : index
    %c0_62 = arith.constant 0 : index
    %129 = vector.load %arg6[%c4_60, %c0_61, %c0_62] : memref<5x32x16xf32, #tpu.memory_space<vmem>>, vector<1x32x16xf32>
    %130 = vector.shape_cast %129 : vector<1x32x16xf32> to vector<32x16xf32>
    %131 = vector.extract_strided_slice %107 {offsets = [0, 4], sizes = [16, 37], strides = [1, 1]} : vector<16x41xf32> to vector<16x37xf32>
    %cst_63 = arith.constant dense<0.000000e+00> : vector<32x37xf32>
    %132 = tpu.matmul %130, %131, %cst_63 {dimension_numbers = #tpu.dot_dimension_numbers<[1], [0], [0], [1], [0, 0, 1, 1], [], []>} : vector<32x16xf32>, vector<16x37xf32>, vector<32x37xf32> -> vector<32x37xf32>
    %133 = arith.addf %128, %132 : vector<32x37xf32>
    %c0_64 = arith.constant 0 : index
    %c0_65 = arith.constant 0 : index
    %134 = vector.load %arg7[%c0_64, %c0_65] : memref<32x1xf32, #tpu.memory_space<vmem>>, vector<32x1xf32>
    %135 = vector.broadcast %134 : vector<32x1xf32> to vector<32x37xf32>
    %136 = arith.addf %133, %135 : vector<32x37xf32>
    %cst_66 = arith.constant 0.000000e+00 : f32
    %137 = vector.broadcast %cst_66 : f32 to vector<32x37xf32>
    %138 = arith.maximumf %136, %137 : vector<32x37xf32>
    %139 = tpu.iota {dimensions = array<i32: 0>} : vector<37x18xi32>
    %140 = tpu.iota {dimensions = array<i32: 1>} : vector<37x18xi32>
    %c2_i32_67 = arith.constant 2 : i32
    %141 = vector.broadcast %c2_i32_67 : i32 to vector<37x18xi32>
    %142 = arith.muli %141, %140 : vector<37x18xi32>
    %143 = arith.cmpi eq, %139, %142 : vector<37x18xi32>
    %cst_68 = arith.constant 1.000000e+00 : f32
    %cst_69 = arith.constant 0.000000e+00 : f32
    %144 = vector.broadcast %cst_68 : f32 to vector<37x18xf32>
    %145 = vector.broadcast %cst_69 : f32 to vector<37x18xf32>
    %146 = arith.select %143, %144, %145 : vector<37x18xi1>, vector<37x18xf32>
    %c2_i32_70 = arith.constant 2 : i32
    %147 = vector.broadcast %c2_i32_70 : i32 to vector<37x18xi32>
    %148 = arith.muli %147, %140 : vector<37x18xi32>
    %c1_i32_71 = arith.constant 1 : i32
    %149 = vector.broadcast %c1_i32_71 : i32 to vector<37x18xi32>
    %150 = arith.addi %148, %149 : vector<37x18xi32>
    %151 = arith.cmpi eq, %139, %150 : vector<37x18xi32>
    %cst_72 = arith.constant 1.000000e+00 : f32
    %cst_73 = arith.constant 0.000000e+00 : f32
    %152 = vector.broadcast %cst_72 : f32 to vector<37x18xf32>
    %153 = vector.broadcast %cst_73 : f32 to vector<37x18xf32>
    %154 = arith.select %151, %152, %153 : vector<37x18xi1>, vector<37x18xf32>
    %cst_74 = arith.constant dense<0.000000e+00> : vector<32x18xf32>
    %155 = tpu.matmul %138, %146, %cst_74 {dimension_numbers = #tpu.dot_dimension_numbers<[1], [0], [0], [1], [0, 0, 1, 1], [], []>} : vector<32x37xf32>, vector<37x18xf32>, vector<32x18xf32> -> vector<32x18xf32>
    %cst_75 = arith.constant dense<0.000000e+00> : vector<32x18xf32>
    %156 = tpu.matmul %138, %154, %cst_75 {dimension_numbers = #tpu.dot_dimension_numbers<[1], [0], [0], [1], [0, 0, 1, 1], [], []>} : vector<32x37xf32>, vector<37x18xf32>, vector<32x18xf32> -> vector<32x18xf32>
    %157 = arith.maximumf %155, %156 : vector<32x18xf32>
    %c0_76 = arith.constant 0 : index
    %c0_77 = arith.constant 0 : index
    %158 = vector.load %arg9[%c0_76, %c0_77] : memref<1x128xf32, #tpu.memory_space<vmem>>, vector<1x128xf32>
    %159 = vector.extract_strided_slice %157 {offsets = [0, 0], sizes = [1, 18], strides = [1, 1]} : vector<32x18xf32> to vector<1x18xf32>
    %c0_78 = arith.constant 0 : index
    %c0_79 = arith.constant 0 : index
    %c0_80 = arith.constant 0 : index
    %160 = vector.load %arg8[%c0_78, %c0_79, %c0_80] : memref<32x18x128xf32, #tpu.memory_space<vmem>>, vector<1x18x128xf32>
    %161 = vector.shape_cast %160 : vector<1x18x128xf32> to vector<18x128xf32>
    %cst_81 = arith.constant dense<0.000000e+00> : vector<1x128xf32>
    %162 = tpu.matmul %159, %161, %cst_81 {dimension_numbers = #tpu.dot_dimension_numbers<[1], [0], [0], [1], [0, 0, 1, 1], [], []>} : vector<1x18xf32>, vector<18x128xf32>, vector<1x128xf32> -> vector<1x128xf32>
    %163 = arith.addf %158, %162 : vector<1x128xf32>
    %164 = vector.extract_strided_slice %157 {offsets = [1, 0], sizes = [1, 18], strides = [1, 1]} : vector<32x18xf32> to vector<1x18xf32>
    %c1_82 = arith.constant 1 : index
    %c0_83 = arith.constant 0 : index
    %c0_84 = arith.constant 0 : index
    %165 = vector.load %arg8[%c1_82, %c0_83, %c0_84] : memref<32x18x128xf32, #tpu.memory_space<vmem>>, vector<1x18x128xf32>
    %166 = vector.shape_cast %165 : vector<1x18x128xf32> to vector<18x128xf32>
    %cst_85 = arith.constant dense<0.000000e+00> : vector<1x128xf32>
    %167 = tpu.matmul %164, %166, %cst_85 {dimension_numbers = #tpu.dot_dimension_numbers<[1], [0], [0], [1], [0, 0, 1, 1], [], []>} : vector<1x18xf32>, vector<18x128xf32>, vector<1x128xf32> -> vector<1x128xf32>
    %168 = arith.addf %163, %167 : vector<1x128xf32>
    %169 = vector.extract_strided_slice %157 {offsets = [2, 0], sizes = [1, 18], strides = [1, 1]} : vector<32x18xf32> to vector<1x18xf32>
    %c2_86 = arith.constant 2 : index
    %c0_87 = arith.constant 0 : index
    %c0_88 = arith.constant 0 : index
    %170 = vector.load %arg8[%c2_86, %c0_87, %c0_88] : memref<32x18x128xf32, #tpu.memory_space<vmem>>, vector<1x18x128xf32>
    %171 = vector.shape_cast %170 : vector<1x18x128xf32> to vector<18x128xf32>
    %cst_89 = arith.constant dense<0.000000e+00> : vector<1x128xf32>
    %172 = tpu.matmul %169, %171, %cst_89 {dimension_numbers = #tpu.dot_dimension_numbers<[1], [0], [0], [1], [0, 0, 1, 1], [], []>} : vector<1x18xf32>, vector<18x128xf32>, vector<1x128xf32> -> vector<1x128xf32>
    %173 = arith.addf %168, %172 : vector<1x128xf32>
    %174 = vector.extract_strided_slice %157 {offsets = [3, 0], sizes = [1, 18], strides = [1, 1]} : vector<32x18xf32> to vector<1x18xf32>
    %c3_90 = arith.constant 3 : index
    %c0_91 = arith.constant 0 : index
    %c0_92 = arith.constant 0 : index
    %175 = vector.load %arg8[%c3_90, %c0_91, %c0_92] : memref<32x18x128xf32, #tpu.memory_space<vmem>>, vector<1x18x128xf32>
    %176 = vector.shape_cast %175 : vector<1x18x128xf32> to vector<18x128xf32>
    %cst_93 = arith.constant dense<0.000000e+00> : vector<1x128xf32>
    %177 = tpu.matmul %174, %176, %cst_93 {dimension_numbers = #tpu.dot_dimension_numbers<[1], [0], [0], [1], [0, 0, 1, 1], [], []>} : vector<1x18xf32>, vector<18x128xf32>, vector<1x128xf32> -> vector<1x128xf32>
    %178 = arith.addf %173, %177 : vector<1x128xf32>
    %179 = vector.extract_strided_slice %157 {offsets = [4, 0], sizes = [1, 18], strides = [1, 1]} : vector<32x18xf32> to vector<1x18xf32>
    %c4_94 = arith.constant 4 : index
    %c0_95 = arith.constant 0 : index
    %c0_96 = arith.constant 0 : index
    %180 = vector.load %arg8[%c4_94, %c0_95, %c0_96] : memref<32x18x128xf32, #tpu.memory_space<vmem>>, vector<1x18x128xf32>
    %181 = vector.shape_cast %180 : vector<1x18x128xf32> to vector<18x128xf32>
    %cst_97 = arith.constant dense<0.000000e+00> : vector<1x128xf32>
    %182 = tpu.matmul %179, %181, %cst_97 {dimension_numbers = #tpu.dot_dimension_numbers<[1], [0], [0], [1], [0, 0, 1, 1], [], []>} : vector<1x18xf32>, vector<18x128xf32>, vector<1x128xf32> -> vector<1x128xf32>
    %183 = arith.addf %178, %182 : vector<1x128xf32>
    %184 = vector.extract_strided_slice %157 {offsets = [5, 0], sizes = [1, 18], strides = [1, 1]} : vector<32x18xf32> to vector<1x18xf32>
    %c5 = arith.constant 5 : index
    %c0_98 = arith.constant 0 : index
    %c0_99 = arith.constant 0 : index
    %185 = vector.load %arg8[%c5, %c0_98, %c0_99] : memref<32x18x128xf32, #tpu.memory_space<vmem>>, vector<1x18x128xf32>
    %186 = vector.shape_cast %185 : vector<1x18x128xf32> to vector<18x128xf32>
    %cst_100 = arith.constant dense<0.000000e+00> : vector<1x128xf32>
    %187 = tpu.matmul %184, %186, %cst_100 {dimension_numbers = #tpu.dot_dimension_numbers<[1], [0], [0], [1], [0, 0, 1, 1], [], []>} : vector<1x18xf32>, vector<18x128xf32>, vector<1x128xf32> -> vector<1x128xf32>
    %188 = arith.addf %183, %187 : vector<1x128xf32>
    %189 = vector.extract_strided_slice %157 {offsets = [6, 0], sizes = [1, 18], strides = [1, 1]} : vector<32x18xf32> to vector<1x18xf32>
    %c6 = arith.constant 6 : index
    %c0_101 = arith.constant 0 : index
    %c0_102 = arith.constant 0 : index
    %190 = vector.load %arg8[%c6, %c0_101, %c0_102] : memref<32x18x128xf32, #tpu.memory_space<vmem>>, vector<1x18x128xf32>
    %191 = vector.shape_cast %190 : vector<1x18x128xf32> to vector<18x128xf32>
    %cst_103 = arith.constant dense<0.000000e+00> : vector<1x128xf32>
    %192 = tpu.matmul %189, %191, %cst_103 {dimension_numbers = #tpu.dot_dimension_numbers<[1], [0], [0], [1], [0, 0, 1, 1], [], []>} : vector<1x18xf32>, vector<18x128xf32>, vector<1x128xf32> -> vector<1x128xf32>
    %193 = arith.addf %188, %192 : vector<1x128xf32>
    %194 = vector.extract_strided_slice %157 {offsets = [7, 0], sizes = [1, 18], strides = [1, 1]} : vector<32x18xf32> to vector<1x18xf32>
    %c7 = arith.constant 7 : index
    %c0_104 = arith.constant 0 : index
    %c0_105 = arith.constant 0 : index
    %195 = vector.load %arg8[%c7, %c0_104, %c0_105] : memref<32x18x128xf32, #tpu.memory_space<vmem>>, vector<1x18x128xf32>
    %196 = vector.shape_cast %195 : vector<1x18x128xf32> to vector<18x128xf32>
    %cst_106 = arith.constant dense<0.000000e+00> : vector<1x128xf32>
    %197 = tpu.matmul %194, %196, %cst_106 {dimension_numbers = #tpu.dot_dimension_numbers<[1], [0], [0], [1], [0, 0, 1, 1], [], []>} : vector<1x18xf32>, vector<18x128xf32>, vector<1x128xf32> -> vector<1x128xf32>
    %198 = arith.addf %193, %197 : vector<1x128xf32>
    %199 = vector.extract_strided_slice %157 {offsets = [8, 0], sizes = [1, 18], strides = [1, 1]} : vector<32x18xf32> to vector<1x18xf32>
    %c8 = arith.constant 8 : index
    %c0_107 = arith.constant 0 : index
    %c0_108 = arith.constant 0 : index
    %200 = vector.load %arg8[%c8, %c0_107, %c0_108] : memref<32x18x128xf32, #tpu.memory_space<vmem>>, vector<1x18x128xf32>
    %201 = vector.shape_cast %200 : vector<1x18x128xf32> to vector<18x128xf32>
    %cst_109 = arith.constant dense<0.000000e+00> : vector<1x128xf32>
    %202 = tpu.matmul %199, %201, %cst_109 {dimension_numbers = #tpu.dot_dimension_numbers<[1], [0], [0], [1], [0, 0, 1, 1], [], []>} : vector<1x18xf32>, vector<18x128xf32>, vector<1x128xf32> -> vector<1x128xf32>
    %203 = arith.addf %198, %202 : vector<1x128xf32>
    %204 = vector.extract_strided_slice %157 {offsets = [9, 0], sizes = [1, 18], strides = [1, 1]} : vector<32x18xf32> to vector<1x18xf32>
    %c9 = arith.constant 9 : index
    %c0_110 = arith.constant 0 : index
    %c0_111 = arith.constant 0 : index
    %205 = vector.load %arg8[%c9, %c0_110, %c0_111] : memref<32x18x128xf32, #tpu.memory_space<vmem>>, vector<1x18x128xf32>
    %206 = vector.shape_cast %205 : vector<1x18x128xf32> to vector<18x128xf32>
    %cst_112 = arith.constant dense<0.000000e+00> : vector<1x128xf32>
    %207 = tpu.matmul %204, %206, %cst_112 {dimension_numbers = #tpu.dot_dimension_numbers<[1], [0], [0], [1], [0, 0, 1, 1], [], []>} : vector<1x18xf32>, vector<18x128xf32>, vector<1x128xf32> -> vector<1x128xf32>
    %208 = arith.addf %203, %207 : vector<1x128xf32>
    %209 = vector.extract_strided_slice %157 {offsets = [10, 0], sizes = [1, 18], strides = [1, 1]} : vector<32x18xf32> to vector<1x18xf32>
    %c10 = arith.constant 10 : index
    %c0_113 = arith.constant 0 : index
    %c0_114 = arith.constant 0 : index
    %210 = vector.load %arg8[%c10, %c0_113, %c0_114] : memref<32x18x128xf32, #tpu.memory_space<vmem>>, vector<1x18x128xf32>
    %211 = vector.shape_cast %210 : vector<1x18x128xf32> to vector<18x128xf32>
    %cst_115 = arith.constant dense<0.000000e+00> : vector<1x128xf32>
    %212 = tpu.matmul %209, %211, %cst_115 {dimension_numbers = #tpu.dot_dimension_numbers<[1], [0], [0], [1], [0, 0, 1, 1], [], []>} : vector<1x18xf32>, vector<18x128xf32>, vector<1x128xf32> -> vector<1x128xf32>
    %213 = arith.addf %208, %212 : vector<1x128xf32>
    %214 = vector.extract_strided_slice %157 {offsets = [11, 0], sizes = [1, 18], strides = [1, 1]} : vector<32x18xf32> to vector<1x18xf32>
    %c11 = arith.constant 11 : index
    %c0_116 = arith.constant 0 : index
    %c0_117 = arith.constant 0 : index
    %215 = vector.load %arg8[%c11, %c0_116, %c0_117] : memref<32x18x128xf32, #tpu.memory_space<vmem>>, vector<1x18x128xf32>
    %216 = vector.shape_cast %215 : vector<1x18x128xf32> to vector<18x128xf32>
    %cst_118 = arith.constant dense<0.000000e+00> : vector<1x128xf32>
    %217 = tpu.matmul %214, %216, %cst_118 {dimension_numbers = #tpu.dot_dimension_numbers<[1], [0], [0], [1], [0, 0, 1, 1], [], []>} : vector<1x18xf32>, vector<18x128xf32>, vector<1x128xf32> -> vector<1x128xf32>
    %218 = arith.addf %213, %217 : vector<1x128xf32>
    %219 = vector.extract_strided_slice %157 {offsets = [12, 0], sizes = [1, 18], strides = [1, 1]} : vector<32x18xf32> to vector<1x18xf32>
    %c12 = arith.constant 12 : index
    %c0_119 = arith.constant 0 : index
    %c0_120 = arith.constant 0 : index
    %220 = vector.load %arg8[%c12, %c0_119, %c0_120] : memref<32x18x128xf32, #tpu.memory_space<vmem>>, vector<1x18x128xf32>
    %221 = vector.shape_cast %220 : vector<1x18x128xf32> to vector<18x128xf32>
    %cst_121 = arith.constant dense<0.000000e+00> : vector<1x128xf32>
    %222 = tpu.matmul %219, %221, %cst_121 {dimension_numbers = #tpu.dot_dimension_numbers<[1], [0], [0], [1], [0, 0, 1, 1], [], []>} : vector<1x18xf32>, vector<18x128xf32>, vector<1x128xf32> -> vector<1x128xf32>
    %223 = arith.addf %218, %222 : vector<1x128xf32>
    %224 = vector.extract_strided_slice %157 {offsets = [13, 0], sizes = [1, 18], strides = [1, 1]} : vector<32x18xf32> to vector<1x18xf32>
    %c13 = arith.constant 13 : index
    %c0_122 = arith.constant 0 : index
    %c0_123 = arith.constant 0 : index
    %225 = vector.load %arg8[%c13, %c0_122, %c0_123] : memref<32x18x128xf32, #tpu.memory_space<vmem>>, vector<1x18x128xf32>
    %226 = vector.shape_cast %225 : vector<1x18x128xf32> to vector<18x128xf32>
    %cst_124 = arith.constant dense<0.000000e+00> : vector<1x128xf32>
    %227 = tpu.matmul %224, %226, %cst_124 {dimension_numbers = #tpu.dot_dimension_numbers<[1], [0], [0], [1], [0, 0, 1, 1], [], []>} : vector<1x18xf32>, vector<18x128xf32>, vector<1x128xf32> -> vector<1x128xf32>
    %228 = arith.addf %223, %227 : vector<1x128xf32>
    %229 = vector.extract_strided_slice %157 {offsets = [14, 0], sizes = [1, 18], strides = [1, 1]} : vector<32x18xf32> to vector<1x18xf32>
    %c14 = arith.constant 14 : index
    %c0_125 = arith.constant 0 : index
    %c0_126 = arith.constant 0 : index
    %230 = vector.load %arg8[%c14, %c0_125, %c0_126] : memref<32x18x128xf32, #tpu.memory_space<vmem>>, vector<1x18x128xf32>
    %231 = vector.shape_cast %230 : vector<1x18x128xf32> to vector<18x128xf32>
    %cst_127 = arith.constant dense<0.000000e+00> : vector<1x128xf32>
    %232 = tpu.matmul %229, %231, %cst_127 {dimension_numbers = #tpu.dot_dimension_numbers<[1], [0], [0], [1], [0, 0, 1, 1], [], []>} : vector<1x18xf32>, vector<18x128xf32>, vector<1x128xf32> -> vector<1x128xf32>
    %233 = arith.addf %228, %232 : vector<1x128xf32>
    %234 = vector.extract_strided_slice %157 {offsets = [15, 0], sizes = [1, 18], strides = [1, 1]} : vector<32x18xf32> to vector<1x18xf32>
    %c15 = arith.constant 15 : index
    %c0_128 = arith.constant 0 : index
    %c0_129 = arith.constant 0 : index
    %235 = vector.load %arg8[%c15, %c0_128, %c0_129] : memref<32x18x128xf32, #tpu.memory_space<vmem>>, vector<1x18x128xf32>
    %236 = vector.shape_cast %235 : vector<1x18x128xf32> to vector<18x128xf32>
    %cst_130 = arith.constant dense<0.000000e+00> : vector<1x128xf32>
    %237 = tpu.matmul %234, %236, %cst_130 {dimension_numbers = #tpu.dot_dimension_numbers<[1], [0], [0], [1], [0, 0, 1, 1], [], []>} : vector<1x18xf32>, vector<18x128xf32>, vector<1x128xf32> -> vector<1x128xf32>
    %238 = arith.addf %233, %237 : vector<1x128xf32>
    %239 = vector.extract_strided_slice %157 {offsets = [16, 0], sizes = [1, 18], strides = [1, 1]} : vector<32x18xf32> to vector<1x18xf32>
    %c16 = arith.constant 16 : index
    %c0_131 = arith.constant 0 : index
    %c0_132 = arith.constant 0 : index
    %240 = vector.load %arg8[%c16, %c0_131, %c0_132] : memref<32x18x128xf32, #tpu.memory_space<vmem>>, vector<1x18x128xf32>
    %241 = vector.shape_cast %240 : vector<1x18x128xf32> to vector<18x128xf32>
    %cst_133 = arith.constant dense<0.000000e+00> : vector<1x128xf32>
    %242 = tpu.matmul %239, %241, %cst_133 {dimension_numbers = #tpu.dot_dimension_numbers<[1], [0], [0], [1], [0, 0, 1, 1], [], []>} : vector<1x18xf32>, vector<18x128xf32>, vector<1x128xf32> -> vector<1x128xf32>
    %243 = arith.addf %238, %242 : vector<1x128xf32>
    %244 = vector.extract_strided_slice %157 {offsets = [17, 0], sizes = [1, 18], strides = [1, 1]} : vector<32x18xf32> to vector<1x18xf32>
    %c17 = arith.constant 17 : index
    %c0_134 = arith.constant 0 : index
    %c0_135 = arith.constant 0 : index
    %245 = vector.load %arg8[%c17, %c0_134, %c0_135] : memref<32x18x128xf32, #tpu.memory_space<vmem>>, vector<1x18x128xf32>
    %246 = vector.shape_cast %245 : vector<1x18x128xf32> to vector<18x128xf32>
    %cst_136 = arith.constant dense<0.000000e+00> : vector<1x128xf32>
    %247 = tpu.matmul %244, %246, %cst_136 {dimension_numbers = #tpu.dot_dimension_numbers<[1], [0], [0], [1], [0, 0, 1, 1], [], []>} : vector<1x18xf32>, vector<18x128xf32>, vector<1x128xf32> -> vector<1x128xf32>
    %248 = arith.addf %243, %247 : vector<1x128xf32>
    %249 = vector.extract_strided_slice %157 {offsets = [18, 0], sizes = [1, 18], strides = [1, 1]} : vector<32x18xf32> to vector<1x18xf32>
    %c18 = arith.constant 18 : index
    %c0_137 = arith.constant 0 : index
    %c0_138 = arith.constant 0 : index
    %250 = vector.load %arg8[%c18, %c0_137, %c0_138] : memref<32x18x128xf32, #tpu.memory_space<vmem>>, vector<1x18x128xf32>
    %251 = vector.shape_cast %250 : vector<1x18x128xf32> to vector<18x128xf32>
    %cst_139 = arith.constant dense<0.000000e+00> : vector<1x128xf32>
    %252 = tpu.matmul %249, %251, %cst_139 {dimension_numbers = #tpu.dot_dimension_numbers<[1], [0], [0], [1], [0, 0, 1, 1], [], []>} : vector<1x18xf32>, vector<18x128xf32>, vector<1x128xf32> -> vector<1x128xf32>
    %253 = arith.addf %248, %252 : vector<1x128xf32>
    %254 = vector.extract_strided_slice %157 {offsets = [19, 0], sizes = [1, 18], strides = [1, 1]} : vector<32x18xf32> to vector<1x18xf32>
    %c19 = arith.constant 19 : index
    %c0_140 = arith.constant 0 : index
    %c0_141 = arith.constant 0 : index
    %255 = vector.load %arg8[%c19, %c0_140, %c0_141] : memref<32x18x128xf32, #tpu.memory_space<vmem>>, vector<1x18x128xf32>
    %256 = vector.shape_cast %255 : vector<1x18x128xf32> to vector<18x128xf32>
    %cst_142 = arith.constant dense<0.000000e+00> : vector<1x128xf32>
    %257 = tpu.matmul %254, %256, %cst_142 {dimension_numbers = #tpu.dot_dimension_numbers<[1], [0], [0], [1], [0, 0, 1, 1], [], []>} : vector<1x18xf32>, vector<18x128xf32>, vector<1x128xf32> -> vector<1x128xf32>
    %258 = arith.addf %253, %257 : vector<1x128xf32>
    %259 = vector.extract_strided_slice %157 {offsets = [20, 0], sizes = [1, 18], strides = [1, 1]} : vector<32x18xf32> to vector<1x18xf32>
    %c20 = arith.constant 20 : index
    %c0_143 = arith.constant 0 : index
    %c0_144 = arith.constant 0 : index
    %260 = vector.load %arg8[%c20, %c0_143, %c0_144] : memref<32x18x128xf32, #tpu.memory_space<vmem>>, vector<1x18x128xf32>
    %261 = vector.shape_cast %260 : vector<1x18x128xf32> to vector<18x128xf32>
    %cst_145 = arith.constant dense<0.000000e+00> : vector<1x128xf32>
    %262 = tpu.matmul %259, %261, %cst_145 {dimension_numbers = #tpu.dot_dimension_numbers<[1], [0], [0], [1], [0, 0, 1, 1], [], []>} : vector<1x18xf32>, vector<18x128xf32>, vector<1x128xf32> -> vector<1x128xf32>
    %263 = arith.addf %258, %262 : vector<1x128xf32>
    %264 = vector.extract_strided_slice %157 {offsets = [21, 0], sizes = [1, 18], strides = [1, 1]} : vector<32x18xf32> to vector<1x18xf32>
    %c21 = arith.constant 21 : index
    %c0_146 = arith.constant 0 : index
    %c0_147 = arith.constant 0 : index
    %265 = vector.load %arg8[%c21, %c0_146, %c0_147] : memref<32x18x128xf32, #tpu.memory_space<vmem>>, vector<1x18x128xf32>
    %266 = vector.shape_cast %265 : vector<1x18x128xf32> to vector<18x128xf32>
    %cst_148 = arith.constant dense<0.000000e+00> : vector<1x128xf32>
    %267 = tpu.matmul %264, %266, %cst_148 {dimension_numbers = #tpu.dot_dimension_numbers<[1], [0], [0], [1], [0, 0, 1, 1], [], []>} : vector<1x18xf32>, vector<18x128xf32>, vector<1x128xf32> -> vector<1x128xf32>
    %268 = arith.addf %263, %267 : vector<1x128xf32>
    %269 = vector.extract_strided_slice %157 {offsets = [22, 0], sizes = [1, 18], strides = [1, 1]} : vector<32x18xf32> to vector<1x18xf32>
    %c22 = arith.constant 22 : index
    %c0_149 = arith.constant 0 : index
    %c0_150 = arith.constant 0 : index
    %270 = vector.load %arg8[%c22, %c0_149, %c0_150] : memref<32x18x128xf32, #tpu.memory_space<vmem>>, vector<1x18x128xf32>
    %271 = vector.shape_cast %270 : vector<1x18x128xf32> to vector<18x128xf32>
    %cst_151 = arith.constant dense<0.000000e+00> : vector<1x128xf32>
    %272 = tpu.matmul %269, %271, %cst_151 {dimension_numbers = #tpu.dot_dimension_numbers<[1], [0], [0], [1], [0, 0, 1, 1], [], []>} : vector<1x18xf32>, vector<18x128xf32>, vector<1x128xf32> -> vector<1x128xf32>
    %273 = arith.addf %268, %272 : vector<1x128xf32>
    %274 = vector.extract_strided_slice %157 {offsets = [23, 0], sizes = [1, 18], strides = [1, 1]} : vector<32x18xf32> to vector<1x18xf32>
    %c23 = arith.constant 23 : index
    %c0_152 = arith.constant 0 : index
    %c0_153 = arith.constant 0 : index
    %275 = vector.load %arg8[%c23, %c0_152, %c0_153] : memref<32x18x128xf32, #tpu.memory_space<vmem>>, vector<1x18x128xf32>
    %276 = vector.shape_cast %275 : vector<1x18x128xf32> to vector<18x128xf32>
    %cst_154 = arith.constant dense<0.000000e+00> : vector<1x128xf32>
    %277 = tpu.matmul %274, %276, %cst_154 {dimension_numbers = #tpu.dot_dimension_numbers<[1], [0], [0], [1], [0, 0, 1, 1], [], []>} : vector<1x18xf32>, vector<18x128xf32>, vector<1x128xf32> -> vector<1x128xf32>
    %278 = arith.addf %273, %277 : vector<1x128xf32>
    %279 = vector.extract_strided_slice %157 {offsets = [24, 0], sizes = [1, 18], strides = [1, 1]} : vector<32x18xf32> to vector<1x18xf32>
    %c24 = arith.constant 24 : index
    %c0_155 = arith.constant 0 : index
    %c0_156 = arith.constant 0 : index
    %280 = vector.load %arg8[%c24, %c0_155, %c0_156] : memref<32x18x128xf32, #tpu.memory_space<vmem>>, vector<1x18x128xf32>
    %281 = vector.shape_cast %280 : vector<1x18x128xf32> to vector<18x128xf32>
    %cst_157 = arith.constant dense<0.000000e+00> : vector<1x128xf32>
    %282 = tpu.matmul %279, %281, %cst_157 {dimension_numbers = #tpu.dot_dimension_numbers<[1], [0], [0], [1], [0, 0, 1, 1], [], []>} : vector<1x18xf32>, vector<18x128xf32>, vector<1x128xf32> -> vector<1x128xf32>
    %283 = arith.addf %278, %282 : vector<1x128xf32>
    %284 = vector.extract_strided_slice %157 {offsets = [25, 0], sizes = [1, 18], strides = [1, 1]} : vector<32x18xf32> to vector<1x18xf32>
    %c25 = arith.constant 25 : index
    %c0_158 = arith.constant 0 : index
    %c0_159 = arith.constant 0 : index
    %285 = vector.load %arg8[%c25, %c0_158, %c0_159] : memref<32x18x128xf32, #tpu.memory_space<vmem>>, vector<1x18x128xf32>
    %286 = vector.shape_cast %285 : vector<1x18x128xf32> to vector<18x128xf32>
    %cst_160 = arith.constant dense<0.000000e+00> : vector<1x128xf32>
    %287 = tpu.matmul %284, %286, %cst_160 {dimension_numbers = #tpu.dot_dimension_numbers<[1], [0], [0], [1], [0, 0, 1, 1], [], []>} : vector<1x18xf32>, vector<18x128xf32>, vector<1x128xf32> -> vector<1x128xf32>
    %288 = arith.addf %283, %287 : vector<1x128xf32>
    %289 = vector.extract_strided_slice %157 {offsets = [26, 0], sizes = [1, 18], strides = [1, 1]} : vector<32x18xf32> to vector<1x18xf32>
    %c26 = arith.constant 26 : index
    %c0_161 = arith.constant 0 : index
    %c0_162 = arith.constant 0 : index
    %290 = vector.load %arg8[%c26, %c0_161, %c0_162] : memref<32x18x128xf32, #tpu.memory_space<vmem>>, vector<1x18x128xf32>
    %291 = vector.shape_cast %290 : vector<1x18x128xf32> to vector<18x128xf32>
    %cst_163 = arith.constant dense<0.000000e+00> : vector<1x128xf32>
    %292 = tpu.matmul %289, %291, %cst_163 {dimension_numbers = #tpu.dot_dimension_numbers<[1], [0], [0], [1], [0, 0, 1, 1], [], []>} : vector<1x18xf32>, vector<18x128xf32>, vector<1x128xf32> -> vector<1x128xf32>
    %293 = arith.addf %288, %292 : vector<1x128xf32>
    %294 = vector.extract_strided_slice %157 {offsets = [27, 0], sizes = [1, 18], strides = [1, 1]} : vector<32x18xf32> to vector<1x18xf32>
    %c27 = arith.constant 27 : index
    %c0_164 = arith.constant 0 : index
    %c0_165 = arith.constant 0 : index
    %295 = vector.load %arg8[%c27, %c0_164, %c0_165] : memref<32x18x128xf32, #tpu.memory_space<vmem>>, vector<1x18x128xf32>
    %296 = vector.shape_cast %295 : vector<1x18x128xf32> to vector<18x128xf32>
    %cst_166 = arith.constant dense<0.000000e+00> : vector<1x128xf32>
    %297 = tpu.matmul %294, %296, %cst_166 {dimension_numbers = #tpu.dot_dimension_numbers<[1], [0], [0], [1], [0, 0, 1, 1], [], []>} : vector<1x18xf32>, vector<18x128xf32>, vector<1x128xf32> -> vector<1x128xf32>
    %298 = arith.addf %293, %297 : vector<1x128xf32>
    %299 = vector.extract_strided_slice %157 {offsets = [28, 0], sizes = [1, 18], strides = [1, 1]} : vector<32x18xf32> to vector<1x18xf32>
    %c28 = arith.constant 28 : index
    %c0_167 = arith.constant 0 : index
    %c0_168 = arith.constant 0 : index
    %300 = vector.load %arg8[%c28, %c0_167, %c0_168] : memref<32x18x128xf32, #tpu.memory_space<vmem>>, vector<1x18x128xf32>
    %301 = vector.shape_cast %300 : vector<1x18x128xf32> to vector<18x128xf32>
    %cst_169 = arith.constant dense<0.000000e+00> : vector<1x128xf32>
    %302 = tpu.matmul %299, %301, %cst_169 {dimension_numbers = #tpu.dot_dimension_numbers<[1], [0], [0], [1], [0, 0, 1, 1], [], []>} : vector<1x18xf32>, vector<18x128xf32>, vector<1x128xf32> -> vector<1x128xf32>
    %303 = arith.addf %298, %302 : vector<1x128xf32>
    %304 = vector.extract_strided_slice %157 {offsets = [29, 0], sizes = [1, 18], strides = [1, 1]} : vector<32x18xf32> to vector<1x18xf32>
    %c29 = arith.constant 29 : index
    %c0_170 = arith.constant 0 : index
    %c0_171 = arith.constant 0 : index
    %305 = vector.load %arg8[%c29, %c0_170, %c0_171] : memref<32x18x128xf32, #tpu.memory_space<vmem>>, vector<1x18x128xf32>
    %306 = vector.shape_cast %305 : vector<1x18x128xf32> to vector<18x128xf32>
    %cst_172 = arith.constant dense<0.000000e+00> : vector<1x128xf32>
    %307 = tpu.matmul %304, %306, %cst_172 {dimension_numbers = #tpu.dot_dimension_numbers<[1], [0], [0], [1], [0, 0, 1, 1], [], []>} : vector<1x18xf32>, vector<18x128xf32>, vector<1x128xf32> -> vector<1x128xf32>
    %308 = arith.addf %303, %307 : vector<1x128xf32>
    %309 = vector.extract_strided_slice %157 {offsets = [30, 0], sizes = [1, 18], strides = [1, 1]} : vector<32x18xf32> to vector<1x18xf32>
    %c30 = arith.constant 30 : index
    %c0_173 = arith.constant 0 : index
    %c0_174 = arith.constant 0 : index
    %310 = vector.load %arg8[%c30, %c0_173, %c0_174] : memref<32x18x128xf32, #tpu.memory_space<vmem>>, vector<1x18x128xf32>
    %311 = vector.shape_cast %310 : vector<1x18x128xf32> to vector<18x128xf32>
    %cst_175 = arith.constant dense<0.000000e+00> : vector<1x128xf32>
    %312 = tpu.matmul %309, %311, %cst_175 {dimension_numbers = #tpu.dot_dimension_numbers<[1], [0], [0], [1], [0, 0, 1, 1], [], []>} : vector<1x18xf32>, vector<18x128xf32>, vector<1x128xf32> -> vector<1x128xf32>
    %313 = arith.addf %308, %312 : vector<1x128xf32>
    %314 = vector.extract_strided_slice %157 {offsets = [31, 0], sizes = [1, 18], strides = [1, 1]} : vector<32x18xf32> to vector<1x18xf32>
    %c31 = arith.constant 31 : index
    %c0_176 = arith.constant 0 : index
    %c0_177 = arith.constant 0 : index
    %315 = vector.load %arg8[%c31, %c0_176, %c0_177] : memref<32x18x128xf32, #tpu.memory_space<vmem>>, vector<1x18x128xf32>
    %316 = vector.shape_cast %315 : vector<1x18x128xf32> to vector<18x128xf32>
    %cst_178 = arith.constant dense<0.000000e+00> : vector<1x128xf32>
    %317 = tpu.matmul %314, %316, %cst_178 {dimension_numbers = #tpu.dot_dimension_numbers<[1], [0], [0], [1], [0, 0, 1, 1], [], []>} : vector<1x18xf32>, vector<18x128xf32>, vector<1x128xf32> -> vector<1x128xf32>
    %318 = arith.addf %313, %317 : vector<1x128xf32>
    %cst_179 = arith.constant 0.000000e+00 : f32
    %319 = vector.broadcast %cst_179 : f32 to vector<1x128xf32>
    %320 = arith.maximumf %318, %319 : vector<1x128xf32>
    %c0_180 = arith.constant 0 : index
    %c0_181 = arith.constant 0 : index
    %321 = vector.load %arg10[%c0_180, %c0_181] : memref<128x5xf32, #tpu.memory_space<vmem>>, vector<128x5xf32>
    %cst_182 = arith.constant dense<0.000000e+00> : vector<1x5xf32>
    %322 = tpu.matmul %320, %321, %cst_182 {dimension_numbers = #tpu.dot_dimension_numbers<[1], [0], [0], [1], [0, 0, 1, 1], [], []>} : vector<1x128xf32>, vector<128x5xf32>, vector<1x5xf32> -> vector<1x5xf32>
    %c0_183 = arith.constant 0 : index
    %c0_184 = arith.constant 0 : index
    %323 = vector.load %arg11[%c0_183, %c0_184] : memref<1x5xf32, #tpu.memory_space<vmem>>, vector<1x5xf32>
    %324 = arith.addf %322, %323 : vector<1x5xf32>
    %c0_185 = arith.constant 0 : index
    %c0_186 = arith.constant 0 : index
    %c0_187 = arith.constant 0 : index
    %325 = vector.load %arg12[%c0_185, %c0_186, %c0_187] : memref<1x1x5xf32, #tpu.memory_space<vmem>>, vector<1x1x5xf32>
    %326 = vector.shape_cast %325 : vector<1x1x5xf32> to vector<1x5xf32>
    %327 = vector.shape_cast %324 : vector<1x5xf32> to vector<1x1x5xf32>
    tpu.vector_store %arg12[%c0_185, %c0_186, %c0_187], %327 {strides = array<i32>} : memref<1x1x5xf32, #tpu.memory_space<vmem>>, vector<1x1x5xf32>,
    return
  }
  func.func @transform_0(%arg0: i32) -> (i32, i32, i32) {
    %c0_i32 = arith.constant 0 : i32
    %c0_i32_0 = arith.constant 0 : i32
    %c0_i32_1 = arith.constant 0 : i32
    return %arg0, %c0_i32, %c0_i32_0 : i32, i32, i32
  }
  func.func @transform_1(%arg0: i32) -> (i32, i32) {
    %c0_i32 = arith.constant 0 : i32
    %c0_i32_0 = arith.constant 0 : i32
    %c0_i32_1 = arith.constant 0 : i32
    return %c0_i32, %c0_i32_0 : i32, i32
  }
  func.func @transform_2(%arg0: i32) -> (i32, i32) {
    %c0_i32 = arith.constant 0 : i32
    %c0_i32_0 = arith.constant 0 : i32
    %c0_i32_1 = arith.constant 0 : i32
    return %c0_i32, %c0_i32_0 : i32, i32
  }
  func.func @transform_3(%arg0: i32) -> (i32, i32, i32) {
    %c0_i32 = arith.constant 0 : i32
    %c0_i32_0 = arith.constant 0 : i32
    %c0_i32_1 = arith.constant 0 : i32
    %c0_i32_2 = arith.constant 0 : i32
    return %c0_i32, %c0_i32_0, %c0_i32_1 : i32, i32, i32
  }
  func.func @transform_4(%arg0: i32) -> (i32, i32) {
    %c0_i32 = arith.constant 0 : i32
    %c0_i32_0 = arith.constant 0 : i32
    %c0_i32_1 = arith.constant 0 : i32
    return %c0_i32, %c0_i32_0 : i32, i32
  }
  func.func @transform_5(%arg0: i32) -> (i32, i32, i32) {
    %c0_i32 = arith.constant 0 : i32
    %c0_i32_0 = arith.constant 0 : i32
    %c0_i32_1 = arith.constant 0 : i32
    %c0_i32_2 = arith.constant 0 : i32
    return %c0_i32, %c0_i32_0, %c0_i32_1 : i32, i32, i32
  }
  func.func @transform_6(%arg0: i32) -> (i32, i32) {
    %c0_i32 = arith.constant 0 : i32
    %c0_i32_0 = arith.constant 0 : i32
    %c0_i32_1 = arith.constant 0 : i32
    return %c0_i32, %c0_i32_0 : i32, i32
  }
  func.func @transform_7(%arg0: i32) -> (i32, i32, i32) {
    %c0_i32 = arith.constant 0 : i32
    %c0_i32_0 = arith.constant 0 : i32
    %c0_i32_1 = arith.constant 0 : i32
    %c0_i32_2 = arith.constant 0 : i32
    return %c0_i32, %c0_i32_0, %c0_i32_1 : i32, i32, i32
  }
  func.func @transform_8(%arg0: i32) -> (i32, i32) {
    %c0_i32 = arith.constant 0 : i32
    %c0_i32_0 = arith.constant 0 : i32
    %c0_i32_1 = arith.constant 0 : i32
    return %c0_i32, %c0_i32_0 : i32, i32
  }
  func.func @transform_9(%arg0: i32) -> (i32, i32) {
    %c0_i32 = arith.constant 0 : i32
    %c0_i32_0 = arith.constant 0 : i32
    %c0_i32_1 = arith.constant 0 : i32
    return %c0_i32, %c0_i32_0 : i32, i32
  }
  func.func @transform_10(%arg0: i32) -> (i32, i32) {
    %c0_i32 = arith.constant 0 : i32
    %c0_i32_0 = arith.constant 0 : i32
    %c0_i32_1 = arith.constant 0 : i32
    return %c0_i32, %c0_i32_0 : i32, i32
  }
  func.func @transform_11(%arg0: i32) -> (i32, i32, i32) {
    %c0_i32 = arith.constant 0 : i32
    %c0_i32_0 = arith.constant 0 : i32
    %c0_i32_1 = arith.constant 0 : i32
    return %arg0, %c0_i32, %c0_i32_0 : i32, i32, i32
  }
}

</mosaic_0001>

<bundles_post_ra>
// kernel: mycnn_forward.1
= control target key start
LH: loop header
LB: loop body
LE: loop exit
PB: predicated region body
PF: predicated region fallthrough
CT: control target
= control target key end

     0   :  { %s7779_s0 = inlined_call_operand.vmem [shape: f32[2,1,178], index: 0, kind: input, shape index: {}]   ;;  %s7780_s1 = inlined_call_operand.vmem [shape: f32[6,5], index: 1, kind: input, shape index: {}]   ;;  %s7781_s2 = inlined_call_operand.vmem [shape: f32[6,1], index: 2, kind: input, shape index: {}]   ;;  %s7782_s3 = inlined_call_operand.vmem [shape: f32[5,16,6], index: 3, kind: input, shape index: {}]   ;;  %s7783_s4 = inlined_call_operand.vmem [shape: f32[16,1], index: 4, kind: input, shape index: {}]   ;;  %s7784_s5 = inlined_call_operand.vmem [shape: f32[5,32,16], index: 5, kind: input, shape index: {}]   ;;  %s7785_s6 = inlined_call_operand.vmem [shape: f32[32,1], index: 6, kind: input, shape index: {}]   ;;  %s7786_s7 = inlined_call_operand.vmem [shape: f32[32,18,128], index: 7, kind: input, shape index: {}]   ;;  %s7787_s8 = inlined_call_operand.vmem [shape: f32[1,128], index: 8, kind: input, shape index: {}]   ;;  %s7788_s9 = inlined_call_operand.vmem [shape: f32[128,5], index: 9, kind: input, shape index: {}]   ;;  %s7789_s10 = inlined_call_operand.vmem [shape: f32[1,5], index: 10, kind: input, shape index: {}]   ;;  %s7790_s11 = inlined_call_operand.hbm [shape: f32[2,1,5], index: 11, kind: output, shape index: {}]  }
   0x1   :  { %7803 = sst [smem:[#allocation5_spill]] %s7779_s0 }
   0x2   :  { %16 = vsyncpa [#allocation3], 0 }
   0x3   :  { %18 = vsyncpa [#allocation3 + $0x1], 0  ;;  %s6502_s17 = smov 0   ;;  %s6504_s18 = smov 0  }
   0x4   :  { %s6506_s19 = smov 0   ;;  %s6508_s20 = smov 0  }
   0x5 LB: > { %s6523_s21 = sadd.s32 4294967295, %s6425_s20   ;;  %s4905_s22 = sadd.s32 4294967294, %s6425_s20   ;;  %s6425_s20 = sphi %s6508_s20, %s7857_s20   ;;  %s6421_s19 = sphi %s6506_s19, %s7856_s19   ;;  %s6417_s18 = sphi %s6504_s18, %s7855_s18   ;;  %s6413_s17 = sphi %s6502_s17, %s7854_s17  }
   0x6   : > { %s6527_s23 = sadd.s32 1, %s6425_s20   ;;  %s267_s24 = sadd.s32 1, %s6421_s19 }
   0x7   : > { %s264_s25 = ssub.s32 %s6425_s20, %s6527_s23  ;;  %p277_p0 = scmp.ne.s32.totalorder %s6421_s19, %s6417_s18 }
   0x8   : > { %p265_p1 = scmp.eq.s32.totalorder %s264_s25, 0  ;;  %p278_p2 = scmp.eq.s32.totalorder %s6523_s21, 1 }
   0x9   : > { %p283_p3 = scmp.ne.s32.totalorder %s6417_s18, %s6413_s17  ;;  %p284_p4 = scmp.eq.s32.totalorder %s4905_s22, 1 }
   0xa   : > { %s6538_s26 = scalar_select %p265_p1, %s6421_s19, %s267_s24  }
   0xb   : > { %p6540_p5 = por %p278_p2, %p277_p0  ;;  %p6544_p6 = por %p284_p4, %p283_p3 }
   0xc   : > { %p4908_p7 = scmp.ge.s32.totalorder %s6425_s20, 1  ;;  %p339_p8 = scmp.lt.s32.totalorder %s6425_s20, 3 }
   0xe   : > { %p340_p9 = pnand %p4908_p7, %p339_p8 }
   0xf   : > { %v382_v0 = vld [vmem:[%s7780_s1] sm:$0x3f] (!%p340_p9)  ;;  %v6427_v1 = vmov (!%p340_p9), 1   ;;  %v6428_v2 = vmov (!%p340_p9), 3   ;;  %v6429_v3 = vmov (!%p340_p9), 2   ;;  %v6430_v4 = vmov (!%p340_p9), 4  }
  0x10   : > { %343 = sbr.rel (%p340_p9) target bundleno = 2426 (0x97a), region = 64  ;;  %6337 = vset.pattern.permute.xlu0 (!%p340_p9), %v6427_v1  ;;  %6339 = vset.pattern.permute.xlu1 (!%p340_p9), %v6428_v2  ;;  %v475_v5 = vld [vmem:[%s7781_s2] sm:$0x3f] (!%p340_p9)  ;;  %v6431_v6 = vmov (!%p340_p9), 0   ;;  %v389_v7 = vlaneseq (!%p340_p9)  ;;  %v6432_v11 = vmov (!%p340_p9), 0.0|0.0   ;;  %p377_p10 = scmp.lt.s32.totalorder (!%p340_p9), %s6523_s21, 1 }
  0x11   : > { %404 = vperm.xlu0 (!%p340_p9), %6337, %v382_v0   ;;  %440 = vperm.xlu1 (!%p340_p9), %6339, %v382_v0   ;;  %v6433_v18 = vmov (!%p340_p9), 1.0|1.0   ;;  %s7816_s0 = sld [smem:[#allocation5_spill]] (!%p340_p9)  ;;  %s6434_s25 = smov (!%p340_p9), 127   ;;  %v6437_v53 = vmov (!%p340_p9), 0.0   ;;  %v6438_v56 = vmov (!%p340_p9), 1.0  }
  0x12   : > { %v6556_v8 = vshrl.u32 (!%p340_p9), %v389_v7, 7  ;;  %v509_v10 = vand.u32 (!%p340_p9), 127, %v389_v7  ;;  %5933 = vmatprep.subr.bf16.mxu0 (!%p340_p9), %v6432_v11  ;;  %s6435_s29 = smov (!%p340_p9), 125   ;;  %s7802_s30 = smov (!%p340_p9), 126   ;;  %v4965_v63 = vld [vmem:[%s7782_s3 + $0x28] sm:$0xff] (!%p340_p9)  ;;  %v4970_v2 = vld [vmem:[%s7782_s3 + $0x38] sm:$0xff] (!%p340_p9) }
  0x13   : > { %s7801_s12 = smov (!%p340_p9), 124   ;;  %s7850_s22 = smov (!%p340_p9), 126   ;;  %v5035_v17 = vld [vmem:[%s7784_s5 + $0x90] sm:$0xff] (!%p340_p9) }
  0x14   : > { %v6559_v9 = vadd.s32 (!%p340_p9), 8, %v6556_v8  ;;  %v6563_v12 = vadd.s32 (!%p340_p9), 16, %v6556_v8  ;;  %v6566_v13 = vadd.s32 (!%p340_p9), 24, %v6556_v8  ;;  %v6568_v14 = vmul.u32 (!%p340_p9), 2, %v509_v10 }
  0x15   : > { %6338 = vset.pattern.permute.xlu0 (!%p340_p9), %v6429_v3  ;;  %6340 = vset.pattern.permute.xlu1 (!%p340_p9), %v6430_v4  ;;  %v6571_v15 = vadd.s32 (!%p340_p9), 32, %v6556_v8  ;;  %v6574_v16 = vadd.s32 (!%p340_p9), 40, %v6556_v8  ;;  %v6601_v20 = vadd.s32 (!%p340_p9), 48, %v6556_v8  ;;  %v6604_v21 = vadd.s32 (!%p340_p9), 56, %v6556_v8 }
  0x16   : > { %422 = vperm.xlu0 (!%p340_p9), %6338, %v382_v0   ;;  %458 = vperm.xlu1 (!%p340_p9), %6340, %v382_v0   ;;  %vm511_vm0 = vcmp.eq.s32.totalorder (!%p340_p9), %v6556_v8, %v6568_v14  ;;  %vm512_vm1 = vcmp.eq.s32.totalorder (!%p340_p9), %v6559_v9, %v6568_v14  ;;  %vm513_vm2 = vcmp.eq.s32.totalorder (!%p340_p9), %v6563_v12, %v6568_v14  ;;  %v6622_v23 = vadd.s32 (!%p340_p9), 64, %v6556_v8 }
  0x17   : > { %vm514_vm3 = vcmp.eq.s32.totalorder %v6566_v13, %v6568_v14  ;;  %vm6584_vm4 = vmpackc.low %vm512_vm1, %vm511_vm0  ;;  %vm7791_vm6 = vcmp.eq.s32.totalorder %v6571_v15, %v6568_v14  ;;  %vm516_vm7 = vcmp.eq.s32.totalorder %v6574_v16, %v6568_v14  ;;  %vm517_vm9 = vcmp.eq.s32.totalorder %v6601_v20, %v6568_v14  ;;  %s378_s14 = scalar_select %p377_p10, %s6523_s21, 1 }
  0x18   : > { %5935 = vmatpush1.bf16.msk.msra.mxu0 %vm6584_vm4, %v6433_v18  ;;  %vm6592_vm5 = vmpackc.low %vm514_vm3, %vm513_vm2  ;;  %vm518_vm10 = vcmp.eq.s32.totalorder %v6604_v21, %v6568_v14  ;;  %v6625_v24 = vadd.s32 72, %v6556_v8  ;;  %vm519_vm12 = vcmp.eq.s32.totalorder %v6622_v23, %v6568_v14  ;;  %v6654_v27 = vadd.s32 80, %v6556_v8 }
  0x19   : > { %5936 = vmatprep.subr.bf16.mxu0 %v6432_v11  ;;  %vm6613_vm8 = vmpackc.low %vm516_vm7, %vm7791_vm6  ;;  %v6657_v28 = vadd.s32 88, %v6556_v8  ;;  %s4909_s15 = sshll.u32 %s378_s14, 1  ;;  %v6668_v29 = vadd.s32 96, %v6556_v8  ;;  %v6671_v30 = vadd.s32 104, %v6556_v8  ;;  %v391_v31 = vsub.s32 0, %v6556_v8  ;;  %s5216_s14 = sshll.u32 %s6523_s21, 4 }
  0x1a   : > { %6341 = vset.pattern.permute.xlu1 %v6431_v6  ;;  %6342 = vset.pattern.permute.xlu0 %v6431_v6  ;;  %vm6631_vm11 = vmpackc.low %vm518_vm10, %vm517_vm9  ;;  %vm520_vm13 = vcmp.eq.s32.totalorder %v6625_v24, %v6568_v14  ;;  %vm7792_vm15 = vcmp.eq.s32.totalorder %v6654_v27, %v6568_v14  ;;  %s380_s24 = scalar_lea.vmem %s7816_s0, %s4909_s15  ;;  %v395_v32 = vsub.s32 1, %v6556_v8  ;;  %v6685_v34 = vadd.s32 112, %v6556_v8  ;;  %s6441_s21 = smov [#allocation2]  }
  0x1b   : > { %385 = vperm.xlu1 %6341, %v382_v0   ;;  %478 = vperm.xlu0 %6342, %v475_v5   ;;  %vm6643_vm14 = vmpackc.low %vm520_vm13, %vm519_vm12  ;;  %vm522_vm0 = vcmp.eq.s32.totalorder %v6657_v28, %v6568_v14  ;;  %vm523_vm2 = vcmp.eq.s32.totalorder %v6668_v29, %v6568_v14  ;;  %vm524_vm3 = vcmp.eq.s32.totalorder %v6671_v30, %v6568_v14  ;;  %v381_v33 = vld [vmem:[%s380_s24] sm:$0x3]  ;;  %v6688_v35 = vadd.s32 120, %v6556_v8  ;;  %v4969_v0 = vld [vmem:[%s7782_s3 + $0x30] sm:$0xff]  ;;  %s6367_s13 = sshll.u32 %s6441_s21, 4  ;;  %s6368_s13 = int_to_ptr.vmem [resolvable:$false] %s6367_s13 }
  0x1c   : > { %5938 = vmatpush1.bf16.msk.msra.mxu0 %vm6592_vm5, %v6433_v18  ;;  %vm5949_vm1 = vmpackc.low %vm522_vm0, %vm7792_vm15  ;;  %vm525_vm9 = vcmp.eq.s32.totalorder %v6685_v34, %v6568_v14  ;;  %v6695_v36 = vrot.slane %v381_v33, %v391_v31  ;;  %v6697_v37 = vrot.slane %v381_v33, %v395_v32  ;;  %v6701_v38 = vadd.s32 128, %v6556_v8  ;;  %s6369_s0 = scalar_lea.vmem %s6368_s13, 32 }
  0x1d   : > { %5939 = vmatprep.subr.bf16.mxu0 %v6432_v11  ;;  %vm5952_vm7 = vmpackc.low %vm524_vm3, %vm523_vm2  ;;  %vm526_vm10 = vcmp.eq.s32.totalorder %v6688_v35, %v6568_v14  ;;  %v503_v39 = vadd.s32 136, %v6556_v8  ;;  %v504_v44 = vadd.s32 144, %v6556_v8  ;;  %v505_v45 = vadd.s32 152, %v6556_v8 }
  0x1e   : > { %vm5955_vm12 = vmpackc.low %vm526_vm10, %vm525_vm9  ;;  %vm527_vm13 = vcmp.eq.s32.totalorder %v6701_v38, %v6568_v14  ;;  %v507_v47 = vadd.s32 168, %v6556_v8  ;;  %v6726_v52 = vadd.s32 160, %v6556_v8  ;;  %v6732_v55 = vadd.s32 1, %v6568_v14 }
  0x1f   : > { %vm528_vm0 = vcmp.eq.s32.totalorder %v503_v39, %v6568_v14  ;;  %vm529_vm2 = vcmp.eq.s32.totalorder %v504_v44, %v6568_v14  ;;  %vm530_vm3 = vcmp.eq.s32.totalorder %v505_v45, %v6568_v14  ;;  %vm7793_vm10 = vcmask 1045504  }
  0x20   : > { %5941 = vmatpush1.bf16.msk.msra.mxu0 %vm6613_vm8, %v6433_v18  ;;  %vm532_vm9 = vcmp.eq.s32.totalorder %v507_v47, %v6568_v14 }
  0x21   : > { %5942 = vmatprep.subr.bf16.mxu0 %v6432_v11  ;;  %v554_v54 = vsel %vm532_vm9, 1.0, %v6437_v53  ;;  %vm571_vm9 = vcmp.eq.s32.totalorder %v6688_v35, %v6732_v55 }
  0x22   : > { %v5964_v57 = vpack.c.bf16 %v554_v54, %v6438_v56  ;;  %v1197_v54 = vld [vmem:[%s7783_s4] sm:$0xff] }
  0x24   : > { %5944 = vmatpush1.bf16.msk.msra.mxu0 %vm6631_vm11, %v6433_v18 }
  0x25   : > { %5945 = vmatprep.subr.bf16.mxu0 %v6432_v11 }
  0x28   : > { %5947 = vmatpush1.bf16.msk.msra.mxu0 %vm6643_vm14, %v6433_v18 }
  0x29   : > { %5948 = vmatprep.subr.bf16.mxu0 %v6432_v11 }
  0x2c   : > { %5950 = vmatpush1.bf16.msk.msra.mxu0 %vm5949_vm1, %v6433_v18  ;;  %vm5958_vm1 = vmpackc.low %vm528_vm0, %vm527_vm13  ;;  %vm577_vm13 = vcmp.eq.s32.totalorder %v507_v47, %v6732_v55 }
  0x2d   : > { %5951 = vmatprep.subr.bf16.mxu0 %v6432_v11  ;;  %v599_v59 = vsel %vm577_vm13, 1.0, %v6437_v53  ;;  %vm572_vm13 = vcmp.eq.s32.totalorder %v6701_v38, %v6732_v55 }
  0x2e   : > { %v6743_v61 = vpack.c.bf16 %v599_v59, %v6438_v56 }
  0x30   : > { %5953 = vmatpush1.bf16.msk.msra.mxu0 %vm5952_vm7, %v6433_v18  ;;  %vm5961_vm7 = vmpackc.low %vm530_vm3, %vm529_vm2  ;;  %vm569_vm2 = vcmp.eq.s32.totalorder %v6671_v30, %v6732_v55 }
  0x31   : > { %5954 = vmatprep.subr.bf16.mxu0 %v6432_v11 }
  0x34   : > { %5956 = vmatpush1.bf16.msk.msra.mxu0 %vm5955_vm12, %v6433_v18  ;;  %vm531_vm12 = vcmp.eq.s32.totalorder %v6726_v52, %v6568_v14 }
  0x35   : > { %5957 = vmatprep.subr.bf16.mxu0 %v6432_v11  ;;  %vm5965_vm0 = vmpackc.low %vm7793_vm10, %vm531_vm12 }
  0x38   : > { %5959 = vmatpush1.bf16.msk.msra.mxu0 %vm5958_vm1, %v6433_v18  ;;  %vm568_vm1 = vcmp.eq.s32.totalorder %v6668_v29, %v6732_v55 }
  0x39   : > { %5960 = vmatprep.subr.bf16.mxu0 %v6432_v11  ;;  %vm6753_vm3 = vmpackc.low %vm569_vm2, %vm568_vm1  ;;  %vm574_vm1 = vcmp.eq.s32.totalorder %v504_v44, %v6732_v55  ;;  %vm575_vm2 = vcmp.eq.s32.totalorder %v505_v45, %v6732_v55 }
  0x3a   : > { %vm6774_vm15 = vmpackc.low %vm575_vm2, %vm574_vm1  ;;  %vm556_vm1 = vcmp.eq.s32.totalorder %v6556_v8, %v6732_v55  ;;  %vm557_vm2 = vcmp.eq.s32.totalorder %v6559_v9, %v6732_v55  ;;  %v7827_v8 = vmov 0 }
  0x3c   : > { %5962 = vmatpush1.bf16.msk.msra.mxu0 %vm5961_vm7, %v6433_v18  ;;  %vm570_vm7 = vcmp.eq.s32.totalorder %v6685_v34, %v6732_v55 }
  0x3d   : > { %5963 = vmatprep.subr.bf16.mxu0 %v6432_v11  ;;  %vm6761_vm12 = vmpackc.low %vm571_vm9, %vm570_vm7  ;;  %vm415_vm7 = vcmask 1039360   ;;  %vm433_vm9 = vcmask 1031168  }
  0x40   : > { %5966 = vmatpush1.bf16.msk.msra.mxu0 %vm5965_vm0, %v5964_v57  ;;  %vm573_vm0 = vcmp.eq.s32.totalorder %v503_v39, %v6732_v55  ;;  %v4957_v57 = vld [vmem:[%s7782_s3 + $0x18] sm:$0xff] }
  0x41   : > { %5967 = vmatprep.subr.bf16.mxu0 %v6432_v11  ;;  %vm6768_vm6 = vmpackc.low %vm573_vm0, %vm572_vm13  ;;  %vm451_vm13 = vcmask 1022976   ;;  %vm469_vm0 = vcmask 1014784  }
  0x90   : > { %v405_v40 = vpop.permute.xlu0 %404  ;;  %v441_v41 = vpop.permute.xlu1 %440 }
  0x91   : > { %v407_v42 = vmul.f32 %v405_v40, %v6695_v36  ;;  %v408_v43 = vmul.f32 %v405_v40, %v6697_v37  ;;  %v443_v46 = vmul.f32 %v441_v41, %v6695_v36  ;;  %v444_v60 = vmul.f32 %v441_v41, %v6697_v37 }
  0x93   : > { %413 = vrot.lane.b32.xlu1 %v408_v43, %s6434_s25  ;;  %411 = vrot.lane.b32.xlu0 %v407_v42, %s6434_s25 }
  0x95   : > { %v423_v48 = vpop.permute.xlu0 %422  ;;  %v459_v49 = vpop.permute.xlu1 %458 }
  0x96   : > { %v425_v50 = vmul.f32 %v423_v48, %v6695_v36  ;;  %v461_v51 = vmul.f32 %v459_v49, %v6695_v36  ;;  %v426_v58 = vmul.f32 %v423_v48, %v6697_v37  ;;  %v462_v62 = vmul.f32 %v459_v49, %v6697_v37 }
  0x97   : > { %447 = vrot.lane.b32.xlu0 %v443_v46, %s6435_s29 }
  0x98   : > { %429 = vrot.lane.b32.xlu1 %v425_v50, %s7802_s30 }
  0x9a   : > { %v386_v3 = vpop.permute.xlu1 %385  ;;  %v479_v4 = vpop.permute.xlu0 %478 }
  0x9b   : > { %465 = vrot.lane.b32.xlu0 %v461_v51, %s7801_s12  ;;  %v400_v10 = vmul.f32 %v6697_v37, %v386_v3  ;;  %v399_v32 = vmul.f32 %v6695_v36, %v386_v3  ;;  %v7825_v51 = vmov 0  ;;  %v4974_v3 = vld [vmem:[%s7782_s3 + $0x40] sm:$0xff] }
  0x9c   : > { %431 = vrot.lane.b32.xlu1 %v426_v58, %s7802_s30  ;;  %v752_v58 = vld [vmem:[%s7782_s3] sm:$0xff] }
  0xa0   : > { %449 = vrot.lane.b32.xlu1 %v444_v60, %s6435_s29  ;;  %v753_v60 = vld [vmem:[%s7782_s3 + $0x8] sm:$0xff] }
  0xa4   : > { %467 = vrot.lane.b32.xlu1 %v462_v62, %s7801_s12 }
 0x105   : > { %v414_v5 = vpop.permute.xlu1 %413  ;;  %v412_v6 = vpop.permute.xlu0 %411 }
 0x106   : > { %v416_v31 = vsel %vm415_vm7, %v412_v6, %v414_v5  ;;  %v420_v33 = vadd.f32 %v414_v5, %v400_v10  ;;  %vm600_vm7 = vcmask 375808  }
 0x107   : > { %v419_v35 = vadd.f32 %v416_v31, %v399_v32 }
 0x109   : > { %v448_v30 = vpop.permute.xlu0 %447 }
 0x10a   : > { %v430_v7 = vpop.permute.xlu1 %429 }
 0x10d   : > { %v466_v42 = vpop.permute.xlu0 %465 }
 0x10e   : > { %v432_v29 = vpop.permute.xlu1 %431 }
 0x10f   : > { %v434_v34 = vsel %vm433_vm9, %v430_v7, %v432_v29  ;;  %v438_v39 = vadd.f32 %v432_v29, %v420_v33  ;;  %vm6784_vm9 = vmpackc.low %vm557_vm2, %vm556_vm1  ;;  %vm7796_vm1 = vcmp.eq.s32.totalorder %v6571_v15, %v6732_v55  ;;  %vm561_vm2 = vcmp.eq.s32.totalorder %v6574_v16, %v6732_v55 }
 0x110   : > { %v437_v41 = vadd.f32 %v434_v34, %v419_v35  ;;  %v7826_v51 = vsel %vm6784_vm9, 4294967295, %v7825_v51  ;;  %v5017_v34 = vld [vmem:[%s7784_s5 + $0x40] sm:$0xff] }
 0x112   : > { %v450_v38 = vpop.permute.xlu1 %449 }
 0x113   : > { %v452_v40 = vsel %vm451_vm13, %v448_v30, %v450_v38  ;;  %v456_v43 = vadd.f32 %v450_v38, %v438_v39  ;;  %vm558_vm13 = vcmp.eq.s32.totalorder %v6563_v12, %v6732_v55  ;;  %v7831_v12 = vmov 0 }
 0x114   : > { %v455_v44 = vadd.f32 %v452_v40, %v437_v41 }
 0x116   : > { %v468_v45 = vpop.permute.xlu1 %467 }
 0x117   : > { %v474_v37 = vadd.f32 %v468_v45, %v456_v43  ;;  %v470_v46 = vsel %vm469_vm0, %v466_v42, %v468_v45  ;;  %vm559_vm0 = vcmp.eq.s32.totalorder %v6566_v13, %v6732_v55  ;;  %v1928_v43 = vld [vmem:[%s7785_s6 + $0x8] sm:$0xff]  ;;  %v1930_v45 = vld [vmem:[%s7785_s6 + $0x18] sm:$0xff] }
 0x118   : > { %v473_v47 = vadd.f32 %v470_v46, %v455_v44  ;;  %vm6796_vm10 = vmpackc.low %vm559_vm0, %vm558_vm13  ;;  %vm562_vm13 = vcmp.eq.s32.totalorder %v6601_v20, %v6732_v55  ;;  %vm563_vm0 = vcmp.eq.s32.totalorder %v6604_v21, %v6732_v55  ;;  %v4956_v21 = vld [vmem:[%s7782_s3 + $0x10] sm:$0xff]  ;;  %v1927_v44 = vld [vmem:[%s7785_s6] sm:$0xff] }
 0x119   : > { %v482_v48 = vadd.f32 %v479_v4, %v474_v37  ;;  %v7828_v8 = vsel %vm6796_vm10, 4294967295, %v7827_v8  ;;  %v1929_v37 = vld [vmem:[%s7785_s6 + $0x10] sm:$0xff] }
 0x11a   : > { %v481_v36 = vadd.f32 %v479_v4, %v473_v47  ;;  %v4975_v4 = vld [vmem:[%s7782_s3 + $0x48] sm:$0xff] }
 0x11b   : > { %v484_v49 = vmax.f32 %v482_v48, 0.0 }
 0x11c   : > { %v483_v50 = vmax.f32 %v481_v36, 0.0 }
 0x11d   : > { %4932 = vmatprep.mubr.msk.f32.mxu0 %vm600_vm7, %v484_v49 }
 0x11e   : > { %673 = vmatmul.mubr.f32.vlgmr.msra.gmra.mrb[0].mxu0 %v483_v50 }
 0x11f   : > { %5969 = vmatpush1.bf16.msk.msra.mxu0 %vm6784_vm9, %v6433_v18  ;;  %4955 = vmatprep.mubr.msk.f32.mxu0 %vm600_vm7, %v484_v49  ;;  %vm6811_vm7 = vmpackc.low %vm561_vm2, %vm7796_vm1  ;;  %vm564_vm2 = vcmp.eq.s32.totalorder %v6622_v23, %v6732_v55  ;;  %vm565_vm1 = vcmp.eq.s32.totalorder %v6625_v24, %v6732_v55 }
 0x120   : > { %5970 = vmatprep.subr.bf16.mxu0 %v6432_v11  ;;  %vm6835_vm9 = vmpackc.low %vm565_vm1, %vm564_vm2 }
 0x123   : > { %5972 = vmatpush1.bf16.msk.msra.mxu0 %vm6796_vm10, %v6433_v18  ;;  %vm6823_vm10 = vmpackc.low %vm563_vm0, %vm562_vm13  ;;  %vm566_vm13 = vcmp.eq.s32.totalorder %v6654_v27, %v6732_v55  ;;  %vm567_vm0 = vcmp.eq.s32.totalorder %v6657_v28, %v6732_v55 }
 0x124   : > { %5973 = vmatprep.subr.bf16.mxu0 %v6432_v11  ;;  %v7832_v12 = vsel %vm6823_vm10, 4294967295, %v7831_v12  ;;  %v588_v31 = vsel %vm566_vm13, 1.0, %v6437_v53 }
 0x127   : > { %5975 = vmatpush1.bf16.msk.msra.mxu0 %vm6811_vm7, %v6433_v18 }
 0x128   : > { %5976 = vmatprep.subr.bf16.mxu0 %v6432_v11 }
 0x12b   : > { %5978 = vmatpush1.bf16.msk.msra.mxu0 %vm6823_vm10, %v6433_v18  ;;  %vm5983_vm10 = vmpackc.low %vm567_vm0, %vm566_vm13  ;;  %vm7853_vm13 = vcmp.eq.s32.totalorder %v6571_v15, %v6732_v55 }
 0x12c   : > { %5979 = vmatprep.subr.bf16.mxu0 %v6432_v11 }
 0x12f   : > { %5981 = vmatpush1.bf16.msk.msra.mxu0 %vm6835_vm9, %v6433_v18 }
 0x130   : > { %5982 = vmatprep.subr.bf16.mxu0 %v6432_v11 }
 0x133   : > { %5984 = vmatpush1.bf16.msk.msra.mxu0 %vm5983_vm10, %v6433_v18  ;;  %vm576_vm10 = vcmp.eq.s32.totalorder %v6726_v52, %v6732_v55  ;;  %v1198_v52 = vld [vmem:[%s7783_s4 + $0x8] sm:$0xff] }
 0x134   : > { %5985 = vmatprep.subr.bf16.mxu0 %v6432_v11 }
 0x137   : > { %5987 = vmatpush1.bf16.msk.msra.mxu0 %vm6753_vm3, %v6433_v18  ;;  %vm7835_vm3 = vcmask 1045504  }
 0x138   : > { %5988 = vmatprep.subr.bf16.mxu0 %v6432_v11  ;;  %vm5999_vm1 = vmpackc.low %vm7835_vm3, %vm576_vm10 }
 0x139   : > { %vm7838_vm2 = vmmov %vm7835_vm3 }
 0x13a   : > { %vm7839_vm0 = vmmov %vm7838_vm2 }
 0x13b   : > { %5990 = vmatpush1.bf16.msk.msra.mxu0 %vm6761_vm12, %v6433_v18  ;;  %vm7837_vm12 = vmmov %vm7835_vm3 }
 0x13c   : > { %5991 = vmatprep.subr.bf16.mxu0 %v6432_v11  ;;  %vm7840_vm10 = vmmov %vm7839_vm0 }
 0x13f   : > { %5993 = vmatpush1.bf16.msk.msra.mxu0 %vm6768_vm6, %v6433_v18  ;;  %vm760_vm6 = vcmask 48128  }
 0x140   : > { %5994 = vmatprep.subr.bf16.mxu0 %v6432_v11 }
 0x143   : > { %5996 = vmatpush1.bf16.msk.msra.mxu0 %vm6774_vm15, %v6433_v18  ;;  %vm7836_vm15 = vmmov %vm7835_vm3 }
 0x144   : > { %5997 = vmatprep.subr.bf16.mxu0 %v6432_v11  ;;  %vm7841_vm3 = vmmov %vm7839_vm0 }
 0x147   : > { %6000 = vmatpush1.bf16.msk.msra.mxu0 %vm5999_vm1, %v6743_v61  ;;  %v4964_v61 = vld [vmem:[%s7782_s3 + $0x20] sm:$0xff]  ;;  %vm7842_vm1 = vmmov %vm7839_vm0 }
 0x14a   : > { %746 = vmatmul.mubr.f32.vlgmr.msra.gmra.mrb[2].mxu0 %v483_v50 }
 0x14b   : > { %5455 = vmatprep.mubr.msk.f32.mxu0 %vm760_vm6, %v4956_v21 }
 0x1f1   : > { %v674_v16 = vpop.f32.mrb[0].mxu0 }
 0x1f2   : > { %v676_v20 = vpop.f32.mrb[1].mxu0 }
 0x21d   : > { %v747_v23 = vpop.f32.mrb[2].mxu0 }
 0x21e   : > { %v751_v24 = vmax.f32 %v674_v16, %v747_v23  ;;  %v749_v28 = vpop.f32.mrb[3].mxu0 }
 0x21f   : > { %v5018_v28 = vld [vmem:[%s7784_s5 + $0x48] sm:$0xff] }
 0x220   : > { %930 = vrot.lane.b32.xlu1 %v751_v24, %s7802_s30  ;;  %758 = vrot.lane.b32.xlu0 %v751_v24, %s6434_s25  ;;  %s7851_s30 = smov 124  }
 0x224   : > { %1110 = vrot.lane.b32.xlu1 %v751_v24, %s7801_s12  ;;  %1020 = vrot.lane.b32.xlu0 %v751_v24, %s6435_s29  ;;  %s375_s12 = sand.u32 1, %s6417_s18  }
 0x225   : > { %s376_s15 = scalar_lea.vmem [#allocation2], %s375_s12 }
 0x226   : > { %s4850_s16 = sshll.u32 %s376_s15, 4  ;;  %s7739_s16 = int_to_ptr.vmem [resolvable:$true] %s4850_s16 }
 0x227   : > { %s6363_s24 = scalar_lea.vmem %s7739_s16, 16  ;;  %p6370_p0 = scmp.lt.s32.totalorder %s7739_s16, %s6368_s13 }
 0x228   : > { %1206 = vperm.xlu1 %6341, %v1198_v52   ;;  %1201 = vperm.xlu0 %6342, %v1197_v54   ;;  %v5006_v54 = vld [vmem:[%s7784_s5 + $0x28] sm:$0xff]  ;;  %p6364_p11 = scmp.ne.s32.totalorder %s7739_s16, %s6363_s24  ;;  %p6371_p1 = scmp.lt.s32.totalorder %s6369_s0, %s6363_s24 }
 0x22a   : > { %p6365_p12 = pnand %p6364_p11, %p6540_p5  ;;  %p6372_p2 = por %p6371_p1, %p6370_p0 }
 0x22c   : > { %p6366_p13 = pneg %p6365_p12 }
 0x22e   : > { %p6373_p3 = pnand %p6372_p2, %p6366_p13 }
 0x292   : > { %v759_v56 = vpop.permute.xlu0 %758  ;;  %v931_v59 = vpop.permute.xlu1 %930 }
 0x293   : > { %5453 = vmatprep.subr.msk.mxu0 %vm7836_vm15, %v759_v56  ;;  %vm7843_vm15 = vmmov %vm7839_vm0 }
 0x294   : > { %5454 = vmatpush3.msk.msra.mxu0 %vm7837_vm12, %v759_v56  ;;  %vm7844_vm12 = vmmov %vm7839_vm0 }
 0x295   : > { %5456 = vmatmul.mubr.msk.f32.vlgmr.msra.gmra.mrb[4].mxu0 %vm760_vm6, %v4957_v57  ;;  %5458 = vmatprep.subr.msk.mxu0 %vm7838_vm2, %v751_v24  ;;  %vm7845_vm2 = vmmov %vm7839_vm0  ;;  %v5019_v57 = vld [vmem:[%s7784_s5 + $0x50] sm:$0xff] }
 0x296   : > { %5459 = vmatpush3.msk.msra.mxu0 %vm7839_vm0, %v751_v24  ;;  %5460 = vmatprep.mubr.msk.f32.mxu0 %vm760_vm6, %v752_v58  ;;  %v1021_v62 = vpop.permute.xlu0 %1020  ;;  %v1111_v1 = vpop.permute.xlu1 %1110  ;;  %vm7848_vm0 = vnez %v7828_v8  ;;  %v5007_v58 = vld [vmem:[%s7784_s5 + $0x30] sm:$0xff] }
 0x297   : > { %5463 = vmatprep.subr.msk.mxu0 %vm7840_vm10, %v931_v59  ;;  %vm7849_vm10 = vnez %v7832_v12 }
 0x29d   : > { %5461 = vmatmul.mubr.msk.f32.vlgmr.msra.gmra.mrb[4].mxu0 %vm760_vm6, %v753_v60  ;;  %v5008_v60 = vld [vmem:[%s7784_s5 + $0x38] sm:$0xff] }
 0x29e   : > { %5464 = vmatpush3.msk.msra.mxu0 %vm7841_vm3, %v931_v59  ;;  %5465 = vmatprep.mubr.msk.f32.mxu0 %vm760_vm6, %v4964_v61  ;;  %v5020_v59 = vld [vmem:[%s7784_s5 + $0x58] sm:$0xff]  ;;  %v5025_v61 = vld [vmem:[%s7784_s5 + $0x60] sm:$0xff]  ;;  %vm2161_vm3 = vcmask 1041408  }
 0x29f   : > { %5468 = vmatprep.subr.msk.mxu0 %vm7842_vm1, %v1021_v62  ;;  %vm6440_vm1 = vmmov 0  }
 0x2a5   : > { %5466 = vmatmul.mubr.msk.f32.vlgmr.msra.gmra.mrb[4].mxu0 %vm760_vm6, %v4965_v63  ;;  %v5026_v63 = vld [vmem:[%s7784_s5 + $0x68] sm:$0xff] }
 0x2a6   : > { %5469 = vmatpush3.msk.msra.mxu0 %vm7843_vm15, %v1021_v62  ;;  %5470 = vmatprep.mubr.msk.f32.mxu0 %vm760_vm6, %v4969_v0  ;;  %v1379_v62 = vld [vmem:[%s7784_s5] sm:$0xff]  ;;  %v1380_v0 = vld [vmem:[%s7784_s5 + $0x8] sm:$0xff]  ;;  %vm2157_vm15 = vcmask 146432  }
 0x2a7   : > { %5473 = vmatprep.subr.msk.mxu0 %vm7844_vm12, %v1111_v1  ;;  %v1207_v25 = vpop.permute.xlu1 %1206  ;;  %v1202_v6 = vpop.permute.xlu0 %1201  ;;  %vm4835_vm12 = vcmask 32768  }
 0x2ad   : > { %5471 = vmatmul.mubr.msk.f32.vlgmr.msra.gmra.mrb[4].mxu0 %vm760_vm6, %v4970_v2  ;;  %v1381_v2 = vld [vmem:[%s7784_s5 + $0x10] sm:$0xff] }
 0x2ae   : > { %5474 = vmatpush3.msk.msra.mxu0 %vm7845_vm2, %v1111_v1  ;;  %5475 = vmatprep.mubr.msk.f32.mxu0 %vm760_vm6, %v4974_v3  ;;  %v5027_v1 = vld [vmem:[%s7784_s5 + $0x70] sm:$0xff]  ;;  %v5028_v3 = vld [vmem:[%s7784_s5 + $0x78] sm:$0xff] }
 0x2af   : > { %6002 = vmatprep.subr.msk.bf16.mxu0 %vm6584_vm4, %v6433_v18 }
 0x2b5   : > { %5476 = vmatmul.mubr.msk.f32.vlgmr.msra.gmra.mrb[4].mxu0 %vm760_vm6, %v4975_v4  ;;  %vm1220_vm6 = vcmask 1042432   ;;  %v1382_v4 = vld [vmem:[%s7784_s5 + $0x18] sm:$0xff] }
 0x2b6   : > { %6004 = vmatpush3.bf16.msk.msra.mxu0 %vm6584_vm4, %v6433_v18 }
 0x2b7   : > { %6006 = vmatprep.subr.msk.bf16.mxu0 %vm6592_vm5, %v6433_v18 }
 0x2ba   : > { %6008 = vmatpush3.bf16.msk.msra.mxu0 %vm6592_vm5, %v6433_v18 }
 0x2bb   : > { %6010 = vmatprep.subr.msk.bf16.mxu0 %vm6613_vm8, %v6433_v18 }
 0x2be   : > { %6012 = vmatpush3.bf16.msk.msra.mxu0 %vm6613_vm8, %v6433_v18  ;;  %vm7846_vm8 = vcmp.eq.s32.totalorder %v6654_v27, %v6568_v14  ;;  %v5005_v27 = vld [vmem:[%s7784_s5 + $0x20] sm:$0xff] }
 0x2bf   : > { %6014 = vmatprep.subr.msk.bf16.mxu0 %vm6631_vm11, %v6433_v18  ;;  %v543_v22 = vsel %vm7846_vm8, 1.0, %v6437_v53 }
 0x2c2   : > { %6016 = vmatpush3.bf16.msk.msra.mxu0 %vm6631_vm11, %v6433_v18  ;;  %vm7847_vm11 = vnez %v7826_v51  ;;  %v2156_v51 = vld [vmem:[%s7786_s7 + $0x10] sm:$0x3] }
 0x2c3   : > { %6018 = vmatprep.subr.msk.bf16.mxu0 %vm6643_vm14, %v6433_v18 }
 0x2c6   : > { %6020 = vmatpush3.bf16.msk.msra.mxu0 %vm6643_vm14, %v6433_v18  ;;  %vm1213_vm14 = vcmask 678912  }
 0x2c7   : > { %5498 = vmatprep.subr.msk.mxu0 %vm1220_vm6, %v543_v22 }
 0x2ca   : > { %5499 = vmatpush3.msk.msra.mxu0 %vm1220_vm6, %v543_v22  ;;  %v5033_v22 = vld [vmem:[%s7784_s5 + $0x80] sm:$0xff] }
 0x2cb   : > { %6022 = vmatprep.subr.msk.bf16.mxu0 %vm7847_vm11, %v6433_v18 }
 0x388   : > { %v5477_v5 = vpop.f32.mrb[4].mxu0 }
 0x389   : > { %v1210_v7 = vadd.f32 %v5477_v5, %v1207_v25  ;;  %v1186_v26 = vpop.f32.mrb[5].mxu0  ;;  %v5034_v25 = vld [vmem:[%s7784_s5 + $0x88] sm:$0xff]  ;;  %v5036_v5 = vld [vmem:[%s7784_s5 + $0x98] sm:$0xff] }
 0x38a   : > { %v1209_v10 = vadd.f32 %v1202_v6, %v1186_v26 }
 0x38b   : > { %v1212_v30 = vmax.f32 %v1210_v7, 0.0 }
 0x38c   : > { %v1211_v29 = vmax.f32 %v1209_v10, 0.0 }
 0x38e   : > { %5500 = vmatprep.mubr.msk.f32.mxu0 %vm1213_vm14, %v1211_v29 }
 0x38f   : > { %5501 = vmatmul.mubr.msk.f32.vlgmr.msra.gmra.mrb[6].mxu0 %vm1213_vm14, %v1212_v30 }
 0x390   : > { %6024 = vmatpush3.bf16.msk.msra.mxu0 %vm7847_vm11, %v6433_v18  ;;  %5525 = vmatprep.mubr.msk.f32.mxu0 %vm1213_vm14, %v1211_v29 }
 0x391   : > { %6026 = vmatprep.subr.msk.bf16.mxu0 %vm7848_vm0, %v6433_v18 }
 0x394   : > { %6028 = vmatpush3.bf16.msk.msra.mxu0 %vm7848_vm0, %v6433_v18 }
 0x395   : > { %6030 = vmatprep.subr.msk.bf16.mxu0 %vm6811_vm7, %v6433_v18 }
 0x398   : > { %6032 = vmatpush3.bf16.msk.msra.mxu0 %vm6811_vm7, %v6433_v18  ;;  %vm1396_vm7 = vcmask 130048  }
 0x399   : > { %6034 = vmatprep.subr.msk.bf16.mxu0 %vm7849_vm10, %v6433_v18  ;;  %5552 = vmatprep.mubr.msk.f32.mxu1 %vm1396_vm7, %v5017_v34 }
 0x39c   : > { %6036 = vmatpush3.bf16.msk.msra.mxu0 %vm7849_vm10, %v6433_v18 }
 0x39d   : > { %6038 = vmatprep.subr.msk.bf16.mxu0 %vm6835_vm9, %v6433_v18 }
 0x3a0   : > { %6040 = vmatpush3.bf16.msk.msra.mxu0 %vm6835_vm9, %v6433_v18  ;;  %vm1972_vm9 = vcmask 1044480  }
 0x3a1   : > { %5523 = vmatprep.subr.msk.mxu0 %vm1220_vm6, %v588_v31 }
 0x3a4   : > { %5524 = vmatpush3.msk.msra.mxu0 %vm1220_vm6, %v588_v31 }
 0x3a5   : > { %5526 = vmatmul.mubr.msk.f32.vlgmr.msra.gmra.mrb[8].mxu0 %vm1213_vm14, %v1212_v30 }
 0x3a6   : > { %5532 = vmatprep.mubr.msk.f32.mxu0 %vm1396_vm7, %v5005_v27 }
 0x462   : > { %v5502_v32 = vpop.f32.mrb[6].mxu0 }
 0x463   : > { %v1290_v33 = vpop.f32.mrb[7].mxu0 }
 0x478   : > { %v5527_v35 = vpop.f32.mrb[8].mxu0 }
 0x479   : > { %v1378_v38 = vmax.f32 %v5502_v32, %v5527_v35  ;;  %v1368_v39 = vpop.f32.mrb[9].mxu0 }
 0x47a   : > { %v1377_v40 = vmax.f32 %v1290_v33, %v1368_v39 }
 0x47c   : > { %v6348_v41 = vpack.i.bf16 %v1378_v38, %v1377_v40  ;;  %v6045_v42 = vpack.c.bf16 %v1378_v38, %v1377_v40 }
 0x47e   : > { %6349 = vrot.lane.b32.xlu1 %v6348_v41, %s6434_s25  ;;  %6344 = vrot.lane.b32.xlu0 %v6348_v41, %s7850_s22 }
 0x482   : > { %6359 = vrot.lane.b32.xlu1 %v6348_v41, %s7851_s30  ;;  %6354 = vrot.lane.b32.xlu0 %v6348_v41, %s6435_s29  ;;  %s7737_s29 = scalar_lea.hbm %s7790_s11, %s5216_s14  ;;  %s4838_s30 = scalar_lea.sflag [#allocation3], %s375_s12 }
 0x486   : > { %1938 = vperm.xlu1 %6341, %v1928_v43   ;;  %1933 = vperm.xlu0 %6342, %v1927_v44  }
 0x48a   : > { %1948 = vperm.xlu1 %6341, %v1930_v45   ;;  %1943 = vperm.xlu0 %6342, %v1929_v37  }
 0x4f0   : > { %v6350_v46 = vpop.permute.xlu1 %6349  ;;  %v6345_v47 = vpop.permute.xlu0 %6344 }
 0x4f1   : > { %v6352_v48 = vunpack.i.h.bf16 %v6350_v46  ;;  %v6351_v36 = vunpack.i.l.bf16 %v6350_v46  ;;  %v6347_v49 = vunpack.i.h.bf16 %v6345_v47  ;;  %v6346_v50 = vunpack.i.l.bf16 %v6345_v47 }
 0x4f3   : > { %v6041_v9 = vpack.c.bf16 %v6352_v48, %v6351_v36  ;;  %v6049_v12 = vpack.c.bf16 %v6347_v49, %v6346_v50  ;;  %v582_v48 = vsel %vm7853_vm13, 1.0, %v6437_v53 }
 0x4f4   : > { %v6360_v13 = vpop.permute.xlu1 %6359  ;;  %v6355_v16 = vpop.permute.xlu0 %6354 }
 0x4f5   : > { %v6362_v20 = vunpack.i.h.bf16 %v6360_v13  ;;  %v6361_v21 = vunpack.i.l.bf16 %v6360_v13  ;;  %v6357_v23 = vunpack.i.h.bf16 %v6355_v16  ;;  %v6356_v24 = vunpack.i.l.bf16 %v6355_v16  ;;  %6042 = vmatprep.subr.bf16.mxu0 %v6041_v9  ;;  %6050 = vmatprep.subr.bf16.mxu1 %v6049_v12 }
 0x4f6   : > { %6044 = vmatpush3.bf16.msra.mxu0 %v6041_v9  ;;  %6052 = vmatpush3.bf16.msra.mxu1 %v6049_v12  ;;  %v5061_v9 = vld [vmem:[%s7786_s7 + $0x18] sm:$0xff]  ;;  %v5062_v12 = vld [vmem:[%s7786_s7 + $0x20] sm:$0xff] }
 0x4f7   : > { %v6053_v52 = vpack.c.bf16 %v6357_v23, %v6356_v24  ;;  %6046 = vmatprep.subr.bf16.mxu0 %v6045_v42  ;;  %v6057_v56 = vpack.c.bf16 %v6362_v20, %v6361_v21  ;;  %v6081_v21 = vpack.c.bf16 %v5062_v12, %v5061_v9  ;;  %v5117_v9 = vld [vmem:[%s7786_s7 + $0x128] sm:$0xff] }
 0x4f9   : > { %5553 = vmatmul.mubr.msk.f32.vlgmr.msra.gmra.mrb[0].mxu1 %vm1396_vm7, %v5018_v28  ;;  %6054 = vmatprep.subr.bf16.mxu1 %v6053_v52 }
 0x4fa   : > { %5533 = vmatmul.mubr.msk.f32.vlgmr.msra.gmra.mrb[10].mxu0 %vm1396_vm7, %v5006_v54  ;;  %6056 = vmatpush3.bf16.msra.mxu1 %v6053_v52 }
 0x4fb   : > { %6048 = vmatpush3.bf16.msra.mxu0 %v6045_v42  ;;  %6058 = vmatprep.subr.bf16.mxu1 %v6057_v56 }
 0x4fc   : > { %5555 = vmatprep.mubr.msk.f32.mxu1 %vm1396_vm7, %v5019_v57  ;;  %5535 = vmatprep.mubr.msk.f32.mxu0 %vm1396_vm7, %v5007_v58  ;;  %v5066_v57 = vld [vmem:[%s7786_s7 + $0x30] sm:$0xff]  ;;  %v5067_v58 = vld [vmem:[%s7786_s7 + $0x38] sm:$0xff] }
 0x4fd   : > { %5556 = vmatmul.mubr.msk.f32.gmra.mrb[2].mxu1 %vm1396_vm7, %v5020_v59  ;;  %6062 = vmatprep.subr.msk.bf16.mxu0 %vm6584_vm4, %v6433_v18  ;;  %v6084_v59 = vpack.c.bf16 %v5067_v58, %v5066_v57  ;;  %v5126_v57 = vld [vmem:[%s7786_s7 + $0x150] sm:$0xff]  ;;  %v5127_v58 = vld [vmem:[%s7786_s7 + $0x158] sm:$0xff] }
 0x4fe   : > { %5536 = vmatmul.mubr.msk.f32.gmra.mrb[12].mxu0 %vm1396_vm7, %v5008_v60  ;;  %5562 = vmatprep.mubr.msk.f32.mxu1 %vm1396_vm7, %v5025_v61  ;;  %v5068_v61 = vld [vmem:[%s7786_s7 + $0x40] sm:$0x3] }
 0x4ff   : > { %5542 = vmatprep.mubr.msk.f32.mxu0 %vm1396_vm7, %v1379_v62  ;;  %v5071_v62 = vld [vmem:[%s7786_s7 + $0x48] sm:$0xff] }
 0x501   : > { %5563 = vmatmul.mubr.msk.f32.vlgmr.msra.gmra.mrb[0].mxu1 %vm1396_vm7, %v5026_v63  ;;  %v5072_v63 = vld [vmem:[%s7786_s7 + $0x50] sm:$0xff] }
 0x502   : > { %6060 = vmatpush3.bf16.msra.mxu1 %v6057_v56  ;;  %5543 = vmatmul.mubr.msk.f32.vlgmr.msra.gmra.mrb[10].mxu0 %vm1396_vm7, %v1380_v0  ;;  %v5063_v56 = vld [vmem:[%s7786_s7 + $0x28] sm:$0x3]  ;;  %v6087_v0 = vpack.c.bf16 %v5072_v63, %v5071_v62  ;;  %v5132_v63 = vld [vmem:[%s7786_s7 + $0x170] sm:$0xff] }
 0x503   : > { %5565 = vmatprep.mubr.msk.f32.mxu1 %vm1396_vm7, %v5027_v1  ;;  %5545 = vmatprep.mubr.msk.f32.mxu0 %vm1396_vm7, %v1381_v2  ;;  %v5073_v2 = vld [vmem:[%s7786_s7 + $0x58] sm:$0x3]  ;;  %v5131_v62 = vld [vmem:[%s7786_s7 + $0x168] sm:$0xff] }
 0x504   : > { %6064 = vmatpush3.bf16.msk.msra.mxu0 %vm6584_vm4, %v6433_v18  ;;  %6077 = vmatprep.subr.bf16.mxu1 %v6432_v11  ;;  %vm7852_vm4 = vcmp.eq.s32.totalorder %v6571_v15, %v6568_v14  ;;  %v2154_v15 = vld [vmem:[%s7786_s7] sm:$0xff] }
 0x505   : > { %5566 = vmatmul.mubr.msk.f32.gmra.mrb[2].mxu1 %vm1396_vm7, %v5028_v3  ;;  %6066 = vmatprep.subr.msk.bf16.mxu0 %vm6592_vm5, %v6433_v18  ;;  %v537_v6 = vsel %vm7852_vm4, 1.0, %v6437_v53  ;;  %v1939_v29 = vpop.permute.xlu1 %1938  ;;  %v1934_v31 = vpop.permute.xlu0 %1933  ;;  %v5076_v3 = vld [vmem:[%s7786_s7 + $0x60] sm:$0xff] }
 0x506   : > { %5546 = vmatmul.mubr.msk.f32.gmra.mrb[12].mxu0 %vm1396_vm7, %v1382_v4  ;;  %5572 = vmatprep.mubr.msk.f32.mxu1 %vm1396_vm7, %v5033_v22  ;;  %v5077_v4 = vld [vmem:[%s7786_s7 + $0x68] sm:$0xff] }
 0x507   : > { %v6090_v22 = vpack.c.bf16 %v5077_v4, %v5076_v3  ;;  %v5136_v3 = vld [vmem:[%s7786_s7 + $0x180] sm:$0xff]  ;;  %v5137_v4 = vld [vmem:[%s7786_s7 + $0x188] sm:$0xff] }
 0x508   : > { %6068 = vmatpush3.bf16.msk.msra.mxu0 %vm6592_vm5, %v6433_v18  ;;  %vm1959_vm5 = vcmask 302080  }
 0x509   : > { %5573 = vmatmul.mubr.msk.f32.vlgmr.msra.gmra.mrb[0].mxu1 %vm1396_vm7, %v5034_v25  ;;  %5586 = vmatprep.subr.msk.mxu0 %vm1972_vm9, %v537_v6  ;;  %v1949_v40 = vpop.permute.xlu1 %1948  ;;  %v1944_v43 = vpop.permute.xlu0 %1943 }
 0x50a   : > { %5575 = vmatprep.mubr.msk.f32.mxu1 %vm1396_vm7, %v5035_v17  ;;  %v5078_v17 = vld [vmem:[%s7786_s7 + $0x70] sm:$0x3] }
 0x50c   : > { %5587 = vmatpush3.msk.msra.mxu0 %vm1972_vm9, %v537_v6  ;;  %v5082_v6 = vld [vmem:[%s7786_s7 + $0x80] sm:$0xff] }
 0x50d   : > { %5576 = vmatmul.mubr.msk.f32.gmra.mrb[2].mxu1 %vm1396_vm7, %v5036_v5  ;;  %6070 = vmatprep.subr.msk.bf16.mxu0 %vm7847_vm11, %v6433_v18  ;;  %v5081_v5 = vld [vmem:[%s7786_s7 + $0x78] sm:$0xff] }
 0x50e   : > { %5616 = vmatprep.mubr.msk.f32.mxu1 %vm6440_vm1, %v6437_v53 }
 0x5d5   : > { %v5544_v19 = vpop.f32.mrb[10].mxu0 }
 0x5d6   : > { %v1572_v7 = vpop.f32.mrb[11].mxu0 }
 0x5d9   : > { %v5547_v26 = vpop.f32.mrb[12].mxu0 }
 0x5da   : > { %v1582_v10 = vpop.f32.mrb[13].mxu0 }
 0x5dc   : > { %v5574_v30 = vpop.f32.mrb[0].mxu1 }
 0x5dd   : > { %v6197_v32 = vadd.f32 %v5574_v30, %v5544_v19  ;;  %v1904_v33 = vpop.f32.mrb[1].mxu1  ;;  %v6093_v19 = vpack.c.bf16 %v5082_v6, %v5081_v5  ;;  %v4749_v5 = vld [vmem:[%s7788_s9 + $0x8] sm:$0xff]  ;;  %v4750_v6 = vld [vmem:[%s7788_s9 + $0x10] sm:$0xff] }
 0x5de   : > { %v6198_v14 = vadd.f32 %v1904_v33, %v1572_v7  ;;  %v5091_v33 = vld [vmem:[%s7786_s7 + $0xa8] sm:$0xff] }
 0x5df   : > { %v1952_v34 = vadd.f32 %v6197_v32, %v1939_v29  ;;  %v5087_v29 = vld [vmem:[%s7786_s7 + $0x98] sm:$0xff]  ;;  %v5088_v32 = vld [vmem:[%s7786_s7 + $0xa0] sm:$0x3] }
 0x5e0   : > { %v1951_v27 = vadd.f32 %v6198_v14, %v1934_v31  ;;  %v5577_v35 = vpop.f32.mrb[2].mxu1  ;;  %v5092_v14 = vld [vmem:[%s7786_s7 + $0xb0] sm:$0xff] }
 0x5e1   : > { %v6199_v38 = vadd.f32 %v5577_v35, %v5547_v26  ;;  %v1914_v39 = vpop.f32.mrb[3].mxu1  ;;  %v1956_v44 = vmax.f32 %v1952_v34, 0.0  ;;  %v5083_v26 = vld [vmem:[%s7786_s7 + $0x88] sm:$0x3]  ;;  %v6099_v34 = vpack.c.bf16 %v5092_v14, %v5091_v33  ;;  %v5093_v35 = vld [vmem:[%s7786_s7 + $0xb8] sm:$0x3] }
 0x5e2   : > { %v1955_v41 = vmax.f32 %v1951_v27, 0.0  ;;  %v6200_v42 = vadd.f32 %v1914_v39, %v1582_v10  ;;  %v5086_v10 = vld [vmem:[%s7786_s7 + $0x90] sm:$0xff]  ;;  %v5097_v39 = vld [vmem:[%s7786_s7 + $0xc8] sm:$0xff] }
 0x5e3   : > { %v1954_v45 = vadd.f32 %v6199_v38, %v1949_v40  ;;  %v6096_v30 = vpack.c.bf16 %v5087_v29, %v5086_v10  ;;  %v5096_v38 = vld [vmem:[%s7786_s7 + $0xc0] sm:$0xff]  ;;  %v4754_v14 = vld [vmem:[%s7788_s9 + $0x30] sm:$0xff] }
 0x5e4   : > { %v1953_v37 = vadd.f32 %v6200_v42, %v1944_v43  ;;  %5588 = vmatprep.mubr.msk.f32.mxu0 %vm1959_vm5, %v1955_v41  ;;  %v6102_v40 = vpack.c.bf16 %v5097_v39, %v5096_v38  ;;  %v5098_v42 = vld [vmem:[%s7786_s7 + $0xd0] sm:$0x3]  ;;  %v5101_v43 = vld [vmem:[%s7786_s7 + $0xd8] sm:$0xff]  ;;  %v5142_v10 = vld [vmem:[%s7786_s7 + $0x1a0] sm:$0xff] }
 0x5e5   : > { %5589 = vmatmul.mubr.msk.f32.vlgmr.msra.gmra.mrb[14].mxu0 %vm1959_vm5, %v1956_v44  ;;  %v1958_v47 = vmax.f32 %v1954_v45, 0.0  ;;  %v5147_v38 = vld [vmem:[%s7786_s7 + $0x1b8] sm:$0xff] }
 0x5e6   : > { %v1957_v46 = vmax.f32 %v1953_v37, 0.0  ;;  %6072 = vmatpush3.bf16.msk.msra.mxu0 %vm7847_vm11, %v6433_v18  ;;  %v5103_v37 = vld [vmem:[%s7786_s7 + $0xe8] sm:$0x3] }
 0x5e7   : > { %6074 = vmatprep.subr.msk.bf16.mxu0 %vm7848_vm0, %v6433_v18 }
 0x5e8   : > { %5591 = vmatprep.mubr.msk.f32.mxu0 %vm1959_vm5, %v1957_v46 }
 0x5e9   : > { %5592 = vmatmul.mubr.msk.f32.gmra.mrb[16].mxu0 %vm1959_vm5, %v1958_v47 }
 0x5ea   : > { %6076 = vmatpush3.bf16.msk.msra.mxu0 %vm7848_vm0, %v6433_v18  ;;  %5604 = vmatprep.mubr.msk.f32.mxu0 %vm1959_vm5, %v1955_v41  ;;  %v2155_v18 = vld [vmem:[%s7786_s7 + $0x8] sm:$0xff] }
 0x5eb   : > { %5602 = vmatprep.subr.msk.mxu0 %vm1972_vm9, %v582_v48  ;;  %v6078_v55 = vpack.c.bf16 %v2155_v18, %v2154_v15  ;;  %v5108_v18 = vld [vmem:[%s7786_s7 + $0x100] sm:$0x3] }
 0x5ed   : > { %6079 = vmatpush3.bf16.msra.mxu1 %v6078_v55  ;;  %v5111_v55 = vld [vmem:[%s7786_s7 + $0x108] sm:$0xff] }
 0x5ee   : > { %5603 = vmatpush3.msk.msra.mxu0 %vm1972_vm9, %v582_v48  ;;  %5614 = vmatprep.subr.mxu1 %v6437_v53 }
 0x5ef   : > { %5605 = vmatmul.mubr.msk.f32.vlgmr.msra.gmra.mrb[18].mxu0 %vm1959_vm5, %v1956_v44  ;;  %6173 = vmatprep.subr.bf16.mxu0 %v6432_v11  ;;  %v5102_v44 = vld [vmem:[%s7786_s7 + $0xe0] sm:$0xff] }
 0x5f0   : > { %5607 = vmatprep.mubr.msk.f32.mxu0 %vm1959_vm5, %v1957_v46  ;;  %v6105_v45 = vpack.c.bf16 %v5102_v44, %v5101_v43  ;;  %v5106_v46 = vld [vmem:[%s7786_s7 + $0xf0] sm:$0xff] }
 0x5f1   : > { %5615 = vmatpush3.msk.msra.mxu1 %vm2161_vm3, %v2156_v51  ;;  %v5112_v51 = vld [vmem:[%s7786_s7 + $0x110] sm:$0xff] }
 0x5f2   : > { %6080 = vmatprep.subr.bf16.mxu1 %v6432_v11 }
 0x5f3   : > { %5608 = vmatmul.mubr.msk.f32.gmra.mrb[20].mxu0 %vm1959_vm5, %v1958_v47  ;;  %v5107_v47 = vld [vmem:[%s7786_s7 + $0xf8] sm:$0xff] }
 0x5f4   : > { %5930 = vmatprep.mubr.msk.f32.mxu0 %vm6440_vm1, %v6437_v53  ;;  %v6108_v48 = vpack.c.bf16 %v5107_v47, %v5106_v46  ;;  %v5148_v46 = vld [vmem:[%s7786_s7 + $0x1c0] sm:$0x3]  ;;  %v5151_v47 = vld [vmem:[%s7786_s7 + $0x1c8] sm:$0xff] }
 0x6b8   : > { %v5590_v8 = vpop.f32.mrb[14].mxu0 }
 0x6b9   : > { %v2042_v36 = vpop.f32.mrb[15].mxu0 }
 0x6bc   : > { %v5593_v49 = vpop.f32.mrb[16].mxu0 }
 0x6bd   : > { %v2052_v50 = vpop.f32.mrb[17].mxu0 }
 0x6c2   : > { %v5606_v13 = vpop.f32.mrb[18].mxu0 }
 0x6c3   : > { %v7172_v16 = vmax.f32 %v5590_v8, %v5606_v13  ;;  %v2130_v20 = vpop.f32.mrb[19].mxu0  ;;  %v6111_v8 = vpack.c.bf16 %v5112_v51, %v5111_v55  ;;  %v4761_v55 = vld [vmem:[%s7788_s9 + $0x68] sm:$0xff] }
 0x6c4   : > { %v7174_v23 = vmax.f32 %v2042_v36, %v2130_v20  ;;  %v5118_v20 = vld [vmem:[%s7786_s7 + $0x130] sm:$0x3] }
 0x6c5   : > { %v2888_v15 = vrot.slane %v7172_v16, 1  ;;  %v2969_v36 = vrot.slane %v7172_v16, 2  ;;  %v3050_v13 = vrot.slane %v7172_v16, 3 }
 0x6c6   : > { %v5609_v24 = vpop.f32.mrb[20].mxu0  ;;  %5617 = vmatmul.mubr.msk.f32.vlgmr.msra.gmra.mrb[4].mxu1 %vm2157_vm15, %v7174_v23  ;;  %v2240_v60 = vrot.slane %v7174_v23, 1  ;;  %v2321_v1 = vrot.slane %v7174_v23, 2  ;;  %v2402_v25 = vrot.slane %v7174_v23, 3  ;;  %v2483_v7 = vrot.slane %v7174_v23, 4 }
 0x6c7   : > { %v7178_v28 = vmax.f32 %v5593_v49, %v5609_v24  ;;  %v2140_v52 = vpop.f32.mrb[21].mxu0  ;;  %6082 = vmatpush3.bf16.msra.mxu1 %v6081_v21  ;;  %5625 = vmatprep.mubr.msk.f32.mxu1 %vm6440_vm1, %v6437_v53  ;;  %v2564_v31 = vrot.slane %v7174_v23, 5  ;;  %v2645_v27 = vrot.slane %v7174_v23, 6  ;;  %v2726_v41 = vrot.slane %v7174_v23, 7  ;;  %v5113_v49 = vld [vmem:[%s7786_s7 + $0x118] sm:$0x3] }
 0x6c8   : > { %v7182_v54 = vmax.f32 %v2052_v50, %v2140_v52  ;;  %5623 = vmatprep.subr.mxu1 %v6437_v53  ;;  %v5116_v50 = vld [vmem:[%s7786_s7 + $0x120] sm:$0xff]  ;;  %v5121_v21 = vld [vmem:[%s7786_s7 + $0x138] sm:$0xff]  ;;  %v3131_v52 = vrot.slane %v7172_v16, 4 }
 0x6c9   : > { %v6114_v12 = vpack.c.bf16 %v5117_v9, %v5116_v50  ;;  %v5122_v23 = vld [vmem:[%s7786_s7 + $0x140] sm:$0xff]  ;;  %v5157_v9 = vld [vmem:[%s7786_s7 + $0x1e8] sm:$0xff] }
 0x6ca   : > { %v6117_v24 = vpack.c.bf16 %v5122_v23, %v5121_v21  ;;  %v3536_v43 = vrot.slane %v7182_v54, 1  ;;  %v5156_v50 = vld [vmem:[%s7786_s7 + $0x1e0] sm:$0xff]  ;;  %v5161_v21 = vld [vmem:[%s7786_s7 + $0x1f8] sm:$0xff] }
 0x6cb   : > { %5624 = vmatpush3.msk.msra.mxu1 %vm2161_vm3, %v5063_v56  ;;  %v5123_v56 = vld [vmem:[%s7786_s7 + $0x148] sm:$0x3]  ;;  %v5162_v23 = vld [vmem:[%s7786_s7 + $0x200] sm:$0xff] }
 0x6cc   : > { %6083 = vmatprep.subr.bf16.mxu1 %v6432_v11 }
 0x6ce   : > { %5626 = vmatmul.mubr.msk.f32.vlgmr.msra.gmra.mrb[4].mxu1 %vm2157_vm15, %v2240_v60  ;;  %v3212_v60 = vrot.slane %v7172_v16, 5 }
 0x6cf   : > { %6085 = vmatpush3.bf16.msra.mxu1 %v6084_v59  ;;  %5634 = vmatprep.mubr.msk.f32.mxu1 %vm6440_vm1, %v6437_v53  ;;  %v6120_v59 = vpack.c.bf16 %v5127_v58, %v5126_v57  ;;  %v5166_v57 = vld [vmem:[%s7786_s7 + $0x210] sm:$0xff]  ;;  %v5167_v58 = vld [vmem:[%s7786_s7 + $0x218] sm:$0xff] }
 0x6d0   : > { %5632 = vmatprep.subr.mxu1 %v6437_v53 }
 0x6d3   : > { %5633 = vmatpush3.msk.msra.mxu1 %vm2161_vm3, %v5068_v61  ;;  %v5128_v61 = vld [vmem:[%s7786_s7 + $0x160] sm:$0x3] }
 0x6d4   : > { %6086 = vmatprep.subr.bf16.mxu1 %v6432_v11 }
 0x6d6   : > { %5635 = vmatmul.mubr.msk.f32.vlgmr.msra.gmra.mrb[4].mxu1 %vm2157_vm15, %v2321_v1  ;;  %v3293_v1 = vrot.slane %v7172_v16, 6 }
 0x6d7   : > { %6088 = vmatpush3.bf16.msra.mxu1 %v6087_v0  ;;  %5643 = vmatprep.mubr.msk.f32.mxu1 %vm6440_vm1, %v6437_v53  ;;  %v6123_v0 = vpack.c.bf16 %v5132_v63, %v5131_v62  ;;  %v5171_v62 = vld [vmem:[%s7786_s7 + $0x228] sm:$0xff]  ;;  %v5172_v63 = vld [vmem:[%s7786_s7 + $0x230] sm:$0xff] }
 0x6d8   : > { %5641 = vmatprep.subr.mxu1 %v6437_v53 }
 0x6db   : > { %5642 = vmatpush3.msk.msra.mxu1 %vm2161_vm3, %v5073_v2  ;;  %v5133_v2 = vld [vmem:[%s7786_s7 + $0x178] sm:$0x3] }
 0x6dc   : > { %6089 = vmatprep.subr.bf16.mxu1 %v6432_v11 }
 0x6de   : > { %5644 = vmatmul.mubr.msk.f32.vlgmr.msra.gmra.mrb[4].mxu1 %vm2157_vm15, %v2402_v25  ;;  %v3374_v25 = vrot.slane %v7172_v16, 7 }
 0x6df   : > { %6091 = vmatpush3.bf16.msra.mxu1 %v6090_v22  ;;  %5652 = vmatprep.mubr.msk.f32.mxu1 %vm6440_vm1, %v6437_v53  ;;  %v6126_v22 = vpack.c.bf16 %v5137_v4, %v5136_v3  ;;  %v5176_v3 = vld [vmem:[%s7786_s7 + $0x240] sm:$0xff]  ;;  %v5177_v4 = vld [vmem:[%s7786_s7 + $0x248] sm:$0xff] }
 0x6e0   : > { %5650 = vmatprep.subr.mxu1 %v6437_v53 }
 0x6e3   : > { %5651 = vmatpush3.msk.msra.mxu1 %vm2161_vm3, %v5078_v17  ;;  %v4748_v17 = vld [vmem:[%s7788_s9] sm:$0xff] }
 0x6e4   : > { %6092 = vmatprep.subr.bf16.mxu1 %v6432_v11 }
 0x6e6   : > { %5653 = vmatmul.mubr.msk.f32.vlgmr.msra.gmra.mrb[4].mxu1 %vm2157_vm15, %v2483_v7  ;;  %v5138_v7 = vld [vmem:[%s7786_s7 + $0x190] sm:$0x3] }
 0x6e7   : > { %6094 = vmatpush3.bf16.msra.mxu1 %v6093_v19  ;;  %5661 = vmatprep.mubr.msk.f32.mxu1 %vm6440_vm1, %v6437_v53  ;;  %v4751_v19 = vld [vmem:[%s7788_s9 + $0x18] sm:$0xff] }
 0x6e8   : > { %5659 = vmatprep.subr.mxu1 %v6437_v53  ;;  %v6177_v29 = vpack.c.bf16 %v4751_v19, %v4750_v6  ;;  %v5186_v19 = vld [vmem:[%s7786_s7 + $0x270] sm:$0xff] }
 0x6eb   : > { %5660 = vmatpush3.msk.msra.mxu1 %vm2161_vm3, %v5083_v26  ;;  %v5141_v26 = vld [vmem:[%s7786_s7 + $0x198] sm:$0xff] }
 0x6ec   : > { %6095 = vmatprep.subr.bf16.mxu1 %v6432_v11 }
 0x6ee   : > { %5662 = vmatmul.mubr.msk.f32.vlgmr.msra.gmra.mrb[4].mxu1 %vm2157_vm15, %v2564_v31  ;;  %v4753_v31 = vld [vmem:[%s7788_s9 + $0x28] sm:$0xff] }
 0x6ef   : > { %6097 = vmatpush3.bf16.msra.mxu1 %v6096_v30  ;;  %5670 = vmatprep.mubr.msk.f32.mxu1 %vm6440_vm1, %v6437_v53  ;;  %v4752_v30 = vld [vmem:[%s7788_s9 + $0x20] sm:$0xff] }
 0x6f0   : > { %5668 = vmatprep.subr.mxu1 %v6437_v53  ;;  %v6180_v33 = vpack.c.bf16 %v4753_v31, %v4752_v30  ;;  %v5191_v30 = vld [vmem:[%s7786_s7 + $0x288] sm:$0xff]  ;;  %v5192_v31 = vld [vmem:[%s7786_s7 + $0x290] sm:$0xff] }
 0x6f3   : > { %5669 = vmatpush3.msk.msra.mxu1 %vm2161_vm3, %v5088_v32  ;;  %v6129_v32 = vpack.c.bf16 %v5142_v10, %v5141_v26  ;;  %v4184_v10 = vrot.slane %v7178_v28, 1 }
 0x6f4   : > { %6098 = vmatprep.subr.bf16.mxu1 %v6432_v11 }
 0x6f6   : > { %5671 = vmatmul.mubr.msk.f32.vlgmr.msra.gmra.mrb[4].mxu1 %vm2157_vm15, %v2645_v27  ;;  %v5143_v27 = vld [vmem:[%s7786_s7 + $0x1a8] sm:$0x3] }
 0x6f7   : > { %6100 = vmatpush3.bf16.msra.mxu1 %v6099_v34  ;;  %5679 = vmatprep.mubr.msk.f32.mxu1 %vm6440_vm1, %v6437_v53  ;;  %v4755_v34 = vld [vmem:[%s7788_s9 + $0x38] sm:$0xff] }
 0x6f8   : > { %5677 = vmatprep.subr.mxu1 %v6437_v53  ;;  %v6183_v39 = vpack.c.bf16 %v4755_v34, %v4754_v14  ;;  %v5193_v14 = vld [vmem:[%s7786_s7 + $0x298] sm:$0x3]  ;;  %v5196_v34 = vld [vmem:[%s7786_s7 + $0x2a0] sm:$0xff] }
 0x6fb   : > { %5678 = vmatpush3.msk.msra.mxu1 %vm2161_vm3, %v5093_v35  ;;  %v5146_v35 = vld [vmem:[%s7786_s7 + $0x1b0] sm:$0xff] }
 0x6fc   : > { %6101 = vmatprep.subr.bf16.mxu1 %v6432_v11 }
 0x6fe   : > { %5680 = vmatmul.mubr.msk.f32.vlgmr.msra.gmra.mrb[4].mxu1 %vm2157_vm15, %v2726_v41  ;;  %v4757_v41 = vld [vmem:[%s7788_s9 + $0x48] sm:$0xff] }
 0x6ff   : > { %6103 = vmatpush3.bf16.msra.mxu1 %v6102_v40  ;;  %5688 = vmatprep.mubr.msk.f32.mxu1 %vm6440_vm1, %v6437_v53  ;;  %v4756_v40 = vld [vmem:[%s7788_s9 + $0x40] sm:$0xff] }
 0x700   : > { %5686 = vmatprep.subr.mxu1 %v6437_v53  ;;  %v6186_v44 = vpack.c.bf16 %v4757_v41, %v4756_v40  ;;  %v5201_v40 = vld [vmem:[%s7786_s7 + $0x2b8] sm:$0xff]  ;;  %v5202_v41 = vld [vmem:[%s7786_s7 + $0x2c0] sm:$0xff] }
 0x703   : > { %5687 = vmatpush3.msk.msra.mxu1 %vm2161_vm3, %v5098_v42  ;;  %v6132_v42 = vpack.c.bf16 %v5147_v38, %v5146_v35  ;;  %v4346_v38 = vrot.slane %v7178_v28, 3 }
 0x704   : > { %6104 = vmatprep.subr.bf16.mxu1 %v6432_v11 }
 0x706   : > { %5689 = vmatmul.mubr.msk.f32.vlgmr.msra.gmra.mrb[4].mxu1 %vm2157_vm15, %v7172_v16  ;;  %v6174_v16 = vpack.c.bf16 %v4749_v5, %v4748_v17  ;;  %v5178_v17 = vld [vmem:[%s7786_s7 + $0x250] sm:$0x3]  ;;  %v5181_v5 = vld [vmem:[%s7786_s7 + $0x258] sm:$0xff] }
 0x707   : > { %6106 = vmatpush3.bf16.msra.mxu1 %v6105_v45  ;;  %5697 = vmatprep.mubr.msk.f32.mxu1 %vm6440_vm1, %v6437_v53  ;;  %v4758_v45 = vld [vmem:[%s7788_s9 + $0x50] sm:$0xff] }
 0x708   : > { %5695 = vmatprep.subr.mxu1 %v6437_v53  ;;  %6175 = vmatpush3.bf16.msra.mxu0 %v6174_v16  ;;  %v5183_v16 = vld [vmem:[%s7786_s7 + $0x268] sm:$0x3] }
 0x709   : > { %6176 = vmatprep.subr.bf16.mxu0 %v6432_v11 }
 0x70b   : > { %5696 = vmatpush3.msk.msra.mxu1 %vm2161_vm3, %v5103_v37  ;;  %v4759_v37 = vld [vmem:[%s7788_s9 + $0x58] sm:$0xff] }
 0x70c   : > { %6107 = vmatprep.subr.bf16.mxu1 %v6432_v11  ;;  %6178 = vmatpush3.bf16.msra.mxu0 %v6177_v29  ;;  %v5188_v29 = vld [vmem:[%s7786_s7 + $0x280] sm:$0x3] }
 0x70d   : > { %6179 = vmatprep.subr.bf16.mxu0 %v6432_v11 }
 0x70e   : > { %5698 = vmatmul.mubr.msk.f32.vlgmr.msra.gmra.mrb[4].mxu1 %vm2157_vm15, %v2888_v15  ;;  %v6189_v15 = vpack.c.bf16 %v4759_v37, %v4758_v45  ;;  %v5206_v45 = vld [vmem:[%s7786_s7 + $0x2d0] sm:$0xff]  ;;  %v5207_v37 = vld [vmem:[%s7786_s7 + $0x2d8] sm:$0xff] }
 0x70f   : > { %6109 = vmatpush3.bf16.msra.mxu1 %v6108_v48  ;;  %5706 = vmatprep.mubr.msk.f32.mxu1 %vm6440_vm1, %v6437_v53  ;;  %v5152_v48 = vld [vmem:[%s7786_s7 + $0x1d0] sm:$0xff] }
 0x710   : > { %5704 = vmatprep.subr.mxu1 %v6437_v53  ;;  %6181 = vmatpush3.bf16.msra.mxu0 %v6180_v33  ;;  %v6135_v51 = vpack.c.bf16 %v5152_v48, %v5151_v47  ;;  %v4265_v33 = vrot.slane %v7178_v28, 2  ;;  %v4508_v47 = vrot.slane %v7178_v28, 5  ;;  %v5208_v48 = vld [vmem:[%s7786_s7 + $0x2e0] sm:$0x3] }
 0x711   : > { %6182 = vmatprep.subr.bf16.mxu0 %v6432_v11 }
 0x713   : > { %5705 = vmatpush3.msk.msra.mxu1 %vm2161_vm3, %v5108_v18  ;;  %v4760_v18 = vld [vmem:[%s7788_s9 + $0x60] sm:$0xff] }
 0x714   : > { %6110 = vmatprep.subr.bf16.mxu1 %v6432_v11  ;;  %6184 = vmatpush3.bf16.msra.mxu0 %v6183_v39  ;;  %v5198_v39 = vld [vmem:[%s7786_s7 + $0x2b0] sm:$0x3] }
 0x715   : > { %6185 = vmatprep.subr.bf16.mxu0 %v6432_v11 }
 0x716   : > { %5707 = vmatmul.mubr.msk.f32.vlgmr.msra.gmra.mrb[4].mxu1 %vm2157_vm15, %v2969_v36  ;;  %v6192_v36 = vpack.c.bf16 %v4761_v55, %v4760_v18  ;;  %v5212_v18 = vld [vmem:[%s7786_s7 + $0x2f0] sm:$0xff] }
 0x717   : > { %6112 = vmatpush3.bf16.msra.mxu1 %v6111_v8  ;;  %5715 = vmatprep.mubr.msk.f32.mxu1 %vm6440_vm1, %v6437_v53  ;;  %v3617_v8 = vrot.slane %v7182_v54, 2 }
 0x718   : > { %5713 = vmatprep.subr.mxu1 %v6437_v53  ;;  %6187 = vmatpush3.bf16.msra.mxu0 %v6186_v44  ;;  %v5203_v44 = vld [vmem:[%s7786_s7 + $0x2c8] sm:$0x3] }
 0x719   : > { %6188 = vmatprep.subr.bf16.mxu0 %v6432_v11 }
 0x71b   : > { %5714 = vmatpush3.msk.msra.mxu1 %vm2161_vm3, %v5113_v49  ;;  %v5153_v49 = vld [vmem:[%s7786_s7 + $0x1d8] sm:$0x3] }
 0x71c   : > { %6113 = vmatprep.subr.bf16.mxu1 %v6432_v11  ;;  %6190 = vmatpush3.bf16.msra.mxu0 %v6189_v15  ;;  %v5211_v15 = vld [vmem:[%s7786_s7 + $0x2e8] sm:$0xff] }
 0x71d   : > { %6191 = vmatprep.subr.bf16.mxu0 %v6432_v11  ;;  %v6171_v55 = vpack.c.bf16 %v5212_v18, %v5211_v15 }
 0x71e   : > { %5716 = vmatmul.mubr.msk.f32.vlgmr.msra.gmra.mrb[4].mxu1 %vm2157_vm15, %v3050_v13  ;;  %v3698_v13 = vrot.slane %v7182_v54, 3 }
 0x71f   : > { %6115 = vmatpush3.bf16.msra.mxu1 %v6114_v12  ;;  %5724 = vmatprep.mubr.msk.f32.mxu1 %vm6440_vm1, %v6437_v53  ;;  %v6138_v12 = vpack.c.bf16 %v5157_v9, %v5156_v50  ;;  %v2153_v50 = vld [vmem:[%s7787_s8] sm:$0x1] }
 0x720   : > { %5722 = vmatprep.subr.mxu1 %v6437_v53  ;;  %6193 = vmatpush3.bf16.msra.mxu0 %v6192_v36  ;;  %v4670_v36 = vrot.slane %v7178_v28, 7 }
 0x721   : > { %6194 = vmatprep.subr.bf16.mxu0 %v6432_v11 }
 0x723   : > { %5723 = vmatpush3.msk.msra.mxu1 %vm2161_vm3, %v5118_v20  ;;  %v5158_v20 = vld [vmem:[%s7786_s7 + $0x1f0] sm:$0x3] }
 0x724   : > { %6116 = vmatprep.subr.bf16.mxu1 %v6432_v11 }
 0x726   : > { %5725 = vmatmul.mubr.msk.f32.vlgmr.msra.gmra.mrb[4].mxu1 %vm2157_vm15, %v3131_v52  ;;  %v3779_v52 = vrot.slane %v7182_v54, 4 }
 0x727   : > { %6118 = vmatpush3.bf16.msra.mxu1 %v6117_v24  ;;  %5733 = vmatprep.mubr.msk.f32.mxu1 %vm6440_vm1, %v6437_v53  ;;  %v6141_v24 = vpack.c.bf16 %v5162_v23, %v5161_v21 }
 0x728   : > { %5731 = vmatprep.subr.mxu1 %v6437_v53 }
 0x72b   : > { %5732 = vmatpush3.msk.msra.mxu1 %vm2161_vm3, %v5123_v56  ;;  %v5163_v56 = vld [vmem:[%s7786_s7 + $0x208] sm:$0x3] }
 0x72c   : > { %6119 = vmatprep.subr.bf16.mxu1 %v6432_v11 }
 0x72e   : > { %5734 = vmatmul.mubr.msk.f32.vlgmr.msra.gmra.mrb[4].mxu1 %vm2157_vm15, %v3212_v60  ;;  %v3860_v60 = vrot.slane %v7182_v54, 5 }
 0x72f   : > { %6121 = vmatpush3.bf16.msra.mxu1 %v6120_v59  ;;  %5742 = vmatprep.mubr.msk.f32.mxu1 %vm6440_vm1, %v6437_v53  ;;  %v6144_v59 = vpack.c.bf16 %v5167_v58, %v5166_v57 }
 0x730   : > { %5740 = vmatprep.subr.mxu1 %v6437_v53 }
 0x733   : > { %5741 = vmatpush3.msk.msra.mxu1 %vm2161_vm3, %v5128_v61  ;;  %v5168_v61 = vld [vmem:[%s7786_s7 + $0x220] sm:$0x3] }
 0x734   : > { %6122 = vmatprep.subr.bf16.mxu1 %v6432_v11 }
 0x736   : > { %5743 = vmatmul.mubr.msk.f32.vlgmr.msra.gmra.mrb[4].mxu1 %vm2157_vm15, %v3293_v1  ;;  %v3941_v1 = vrot.slane %v7182_v54, 6 }
 0x737   : > { %6124 = vmatpush3.bf16.msra.mxu1 %v6123_v0  ;;  %5751 = vmatprep.mubr.msk.f32.mxu1 %vm6440_vm1, %v6437_v53  ;;  %v6147_v0 = vpack.c.bf16 %v5172_v63, %v5171_v62 }
 0x738   : > { %5749 = vmatprep.subr.mxu1 %v6437_v53 }
 0x73b   : > { %5750 = vmatpush3.msk.msra.mxu1 %vm2161_vm3, %v5133_v2  ;;  %v5173_v2 = vld [vmem:[%s7786_s7 + $0x238] sm:$0x3] }
 0x73c   : > { %6125 = vmatprep.subr.bf16.mxu1 %v6432_v11 }
 0x73e   : > { %5752 = vmatmul.mubr.msk.f32.vlgmr.msra.gmra.mrb[4].mxu1 %vm2157_vm15, %v3374_v25  ;;  %v4022_v25 = vrot.slane %v7182_v54, 7 }
 0x73f   : > { %6127 = vmatpush3.bf16.msra.mxu1 %v6126_v22  ;;  %5760 = vmatprep.mubr.msk.f32.mxu1 %vm6440_vm1, %v6437_v53  ;;  %v6150_v22 = vpack.c.bf16 %v5177_v4, %v5176_v3 }
 0x740   : > { %5758 = vmatprep.subr.mxu1 %v6437_v53 }
 0x743   : > { %5759 = vmatpush3.msk.msra.mxu1 %vm2161_vm3, %v5138_v7  ;;  %v5187_v7 = vld [vmem:[%s7786_s7 + $0x278] sm:$0xff] }
 0x744   : > { %6128 = vmatprep.subr.bf16.mxu1 %v6432_v11  ;;  %v6156_v26 = vpack.c.bf16 %v5187_v7, %v5186_v19 }
 0x746   : > { %5761 = vmatmul.mubr.msk.f32.vlgmr.msra.gmra.mrb[4].mxu1 %vm2157_vm15, %v7182_v54  ;;  %v5182_v54 = vld [vmem:[%s7786_s7 + $0x260] sm:$0xff] }
 0x747   : > { %6130 = vmatpush3.bf16.msra.mxu1 %v6129_v32  ;;  %5769 = vmatprep.mubr.msk.f32.mxu1 %vm6440_vm1, %v6437_v53  ;;  %v6153_v6 = vpack.c.bf16 %v5182_v54, %v5181_v5  ;;  %v6159_v32 = vpack.c.bf16 %v5192_v31, %v5191_v30 }
 0x748   : > { %5767 = vmatprep.subr.mxu1 %v6437_v53 }
 0x74b   : > { %5768 = vmatpush3.msk.msra.mxu1 %vm2161_vm3, %v5143_v27  ;;  %v5197_v27 = vld [vmem:[%s7786_s7 + $0x2a8] sm:$0xff] }
 0x74c   : > { %6131 = vmatprep.subr.bf16.mxu1 %v6432_v11  ;;  %v6162_v35 = vpack.c.bf16 %v5197_v27, %v5196_v34 }
 0x74e   : > { %5770 = vmatmul.mubr.msk.f32.vlgmr.msra.gmra.mrb[4].mxu1 %vm2157_vm15, %v3536_v43  ;;  %v4427_v43 = vrot.slane %v7178_v28, 4 }
 0x74f   : > { %6133 = vmatpush3.bf16.msra.mxu1 %v6132_v42  ;;  %5778 = vmatprep.mubr.msk.f32.mxu1 %vm6440_vm1, %v6437_v53  ;;  %v6165_v42 = vpack.c.bf16 %v5202_v41, %v5201_v40 }
 0x750   : > { %5776 = vmatprep.subr.mxu1 %v6437_v53 }
 0x753   : > { %5777 = vmatpush3.msk.msra.mxu1 %vm2161_vm3, %v5148_v46  ;;  %v6168_v46 = vpack.c.bf16 %v5207_v37, %v5206_v45 }
 0x754   : > { %6134 = vmatprep.subr.bf16.mxu1 %v6432_v11 }
 0x756   : > { %5779 = vmatmul.mubr.msk.f32.vlgmr.msra.gmra.mrb[4].mxu1 %vm2157_vm15, %v3617_v8  ;;  %v5213_v8 = vld [vmem:[%s7786_s7 + $0x2f8] sm:$0x3] }
 0x757   : > { %6136 = vmatpush3.bf16.msra.mxu1 %v6135_v51  ;;  %5787 = vmatprep.mubr.msk.f32.mxu1 %vm6440_vm1, %v6437_v53  ;;  %v4589_v51 = vrot.slane %v7178_v28, 6 }
 0x758   : > { %5785 = vmatprep.subr.mxu1 %v6437_v53 }
 0x75b   : > { %5786 = vmatpush3.msk.msra.mxu1 %vm2161_vm3, %v5153_v49  ;;  %v4763_v49 = vld [vmem:[%s7788_s9 + $0x78] sm:$0xff] }
 0x75c   : > { %6137 = vmatprep.subr.bf16.mxu1 %v6432_v11 }
 0x75e   : > { %5788 = vmatmul.mubr.msk.f32.vlgmr.msra.gmra.mrb[4].mxu1 %vm2157_vm15, %v3698_v13 }
 0x75f   : > { %6139 = vmatpush3.bf16.msra.mxu1 %v6138_v12  ;;  %5796 = vmatprep.mubr.msk.f32.mxu1 %vm6440_vm1, %v6437_v53 }
 0x760   : > { %5794 = vmatprep.subr.mxu1 %v6437_v53 }
 0x763   : > { %5795 = vmatpush3.msk.msra.mxu1 %vm2161_vm3, %v5158_v20  ;;  %v4764_v20 = vld [vmem:[%s7789_s10] sm:$0x1] }
 0x764   : > { %6140 = vmatprep.subr.bf16.mxu1 %v6432_v11 }
 0x766   : > { %5797 = vmatmul.mubr.msk.f32.vlgmr.msra.gmra.mrb[4].mxu1 %vm2157_vm15, %v3779_v52 }
 0x767   : > { %6142 = vmatpush3.bf16.msra.mxu1 %v6141_v24  ;;  %5805 = vmatprep.mubr.msk.f32.mxu1 %vm6440_vm1, %v6437_v53 }
 0x768   : > { %5803 = vmatprep.subr.mxu1 %v6437_v53 }
 0x76b   : > { %5804 = vmatpush3.msk.msra.mxu1 %vm2161_vm3, %v5163_v56 }
 0x76c   : > { %6143 = vmatprep.subr.bf16.mxu1 %v6432_v11 }
 0x76e   : > { %5806 = vmatmul.mubr.msk.f32.vlgmr.msra.gmra.mrb[4].mxu1 %vm2157_vm15, %v3860_v60 }
 0x76f   : > { %6145 = vmatpush3.bf16.msra.mxu1 %v6144_v59  ;;  %5814 = vmatprep.mubr.msk.f32.mxu1 %vm6440_vm1, %v6437_v53 }
 0x770   : > { %5812 = vmatprep.subr.mxu1 %v6437_v53 }
 0x773   : > { %5813 = vmatpush3.msk.msra.mxu1 %vm2161_vm3, %v5168_v61 }
 0x774   : > { %6146 = vmatprep.subr.bf16.mxu1 %v6432_v11 }
 0x776   : > { %5815 = vmatmul.mubr.msk.f32.vlgmr.msra.gmra.mrb[4].mxu1 %vm2157_vm15, %v3941_v1 }
 0x777   : > { %6148 = vmatpush3.bf16.msra.mxu1 %v6147_v0  ;;  %5823 = vmatprep.mubr.msk.f32.mxu1 %vm6440_vm1, %v6437_v53 }
 0x778   : > { %5821 = vmatprep.subr.mxu1 %v6437_v53 }
 0x77b   : > { %5822 = vmatpush3.msk.msra.mxu1 %vm2161_vm3, %v5173_v2 }
 0x77c   : > { %6149 = vmatprep.subr.bf16.mxu1 %v6432_v11 }
 0x77e   : > { %5824 = vmatmul.mubr.msk.f32.vlgmr.msra.gmra.mrb[4].mxu1 %vm2157_vm15, %v4022_v25 }
 0x77f   : > { %6151 = vmatpush3.bf16.msra.mxu1 %v6150_v22  ;;  %5832 = vmatprep.mubr.msk.f32.mxu1 %vm6440_vm1, %v6437_v53 }
 0x780   : > { %5830 = vmatprep.subr.mxu1 %v6437_v53 }
 0x783   : > { %5831 = vmatpush3.msk.msra.mxu1 %vm2161_vm3, %v5178_v17 }
 0x784   : > { %6152 = vmatprep.subr.bf16.mxu1 %v6432_v11 }
 0x786   : > { %5833 = vmatmul.mubr.msk.f32.vlgmr.msra.gmra.mrb[4].mxu1 %vm2157_vm15, %v7178_v28 }
 0x787   : > { %6154 = vmatpush3.bf16.msra.mxu1 %v6153_v6  ;;  %5841 = vmatprep.mubr.msk.f32.mxu1 %vm6440_vm1, %v6437_v53 }
 0x788   : > { %5839 = vmatprep.subr.mxu1 %v6437_v53 }
 0x78b   : > { %5840 = vmatpush3.msk.msra.mxu1 %vm2161_vm3, %v5183_v16 }
 0x78c   : > { %6155 = vmatprep.subr.bf16.mxu1 %v6432_v11 }
 0x78e   : > { %5842 = vmatmul.mubr.msk.f32.vlgmr.msra.gmra.mrb[4].mxu1 %vm2157_vm15, %v4184_v10 }
 0x78f   : > { %6157 = vmatpush3.bf16.msra.mxu1 %v6156_v26  ;;  %5850 = vmatprep.mubr.msk.f32.mxu1 %vm6440_vm1, %v6437_v53 }
 0x790   : > { %5848 = vmatprep.subr.mxu1 %v6437_v53 }
 0x793   : > { %5849 = vmatpush3.msk.msra.mxu1 %vm2161_vm3, %v5188_v29 }
 0x794   : > { %6158 = vmatprep.subr.bf16.mxu1 %v6432_v11 }
 0x796   : > { %5851 = vmatmul.mubr.msk.f32.vlgmr.msra.gmra.mrb[4].mxu1 %vm2157_vm15, %v4265_v33 }
 0x797   : > { %6160 = vmatpush3.bf16.msra.mxu1 %v6159_v32  ;;  %5859 = vmatprep.mubr.msk.f32.mxu1 %vm6440_vm1, %v6437_v53 }
 0x798   : > { %5857 = vmatprep.subr.mxu1 %v6437_v53 }
 0x79b   : > { %5858 = vmatpush3.msk.msra.mxu1 %vm2161_vm3, %v5193_v14 }
 0x79c   : > { %6161 = vmatprep.subr.bf16.mxu1 %v6432_v11 }
 0x79e   : > { %5860 = vmatmul.mubr.msk.f32.vlgmr.msra.gmra.mrb[4].mxu1 %vm2157_vm15, %v4346_v38 }
 0x79f   : > { %6163 = vmatpush3.bf16.msra.mxu1 %v6162_v35  ;;  %5868 = vmatprep.mubr.msk.f32.mxu1 %vm6440_vm1, %v6437_v53 }
 0x7a0   : > { %5866 = vmatprep.subr.mxu1 %v6437_v53 }
 0x7a3   : > { %5867 = vmatpush3.msk.msra.mxu1 %vm2161_vm3, %v5198_v39 }
 0x7a4   : > { %6164 = vmatprep.subr.bf16.mxu1 %v6432_v11 }
 0x7a6   : > { %5869 = vmatmul.mubr.msk.f32.vlgmr.msra.gmra.mrb[4].mxu1 %vm2157_vm15, %v4427_v43 }
 0x7a7   : > { %6166 = vmatpush3.bf16.msra.mxu1 %v6165_v42  ;;  %5877 = vmatprep.mubr.msk.f32.mxu1 %vm6440_vm1, %v6437_v53 }
 0x7a8   : > { %5875 = vmatprep.subr.mxu1 %v6437_v53 }
 0x7ab   : > { %5876 = vmatpush3.msk.msra.mxu1 %vm2161_vm3, %v5203_v44 }
 0x7ac   : > { %6167 = vmatprep.subr.bf16.mxu1 %v6432_v11 }
 0x7ae   : > { %5878 = vmatmul.mubr.msk.f32.vlgmr.msra.gmra.mrb[4].mxu1 %vm2157_vm15, %v4508_v47 }
 0x7af   : > { %6169 = vmatpush3.bf16.msra.mxu1 %v6168_v46  ;;  %5886 = vmatprep.mubr.msk.f32.mxu1 %vm6440_vm1, %v6437_v53 }
 0x7b0   : > { %5884 = vmatprep.subr.mxu1 %v6437_v53 }
 0x7b3   : > { %5885 = vmatpush3.msk.msra.mxu1 %vm2161_vm3, %v5208_v48 }
 0x7b4   : > { %6170 = vmatprep.subr.bf16.mxu1 %v6432_v11  ;;  %v4762_v11 = vld [vmem:[%s7788_s9 + $0x70] sm:$0xff] }
 0x7b6   : > { %5887 = vmatmul.mubr.msk.f32.vlgmr.msra.gmra.mrb[4].mxu1 %vm2157_vm15, %v4589_v51 }
 0x7b7   : > { %6172 = vmatpush3.bf16.msra.mxu1 %v6171_v55  ;;  %5895 = vmatprep.mubr.msk.f32.mxu1 %vm6440_vm1, %v6437_v53 }
 0x7b8   : > { %5893 = vmatprep.subr.mxu1 %v6437_v53  ;;  %v6195_v53 = vpack.c.bf16 %v4763_v49, %v4762_v11 }
 0x7ba   : > { %6196 = vmatpush3.bf16.msra.mxu0 %v6195_v53 }
 0x7bb   : > { %5894 = vmatpush3.msk.msra.mxu1 %vm2161_vm3, %v5213_v8 }
 0x7be   : > { %5896 = vmatmul.mubr.msk.f32.vlgmr.msra.gmra.mrb[4].mxu1 %vm2157_vm15, %v4670_v36 }
 0x891   : > { %v4742_v9 = vpop.f32.mrb[4].mxu1 }
 0x892   : > { %v6201_v12 = vadd.f32 %v4742_v9, %v2153_v50  ;;  %v5897_v13 = vpop.f32.mrb[5].mxu1 }
 0x894   : > { %v4747_v28 = vmax.f32 %v6201_v12, 0.0 }
 0x896   : > { %5931 = vmatmul.mubr.f32.vlgmr.msra.gmra.mrb[22].mxu0 %v4747_v28 }
 0x969   : > { %v4831_v21 = vpop.f32.mrb[22].mxu0 }
 0x96a   : > { %v4832_v23 = vadd.f32 %v4831_v21, %v4764_v20  ;;  %v5932_v24 = vpop.f32.mrb[23].mxu0 }
 0x96c   : > { %4836 = vst.msk [vmem:[%s376_s15] sm:$0x1] %vm4835_vm12, %v4832_v23 }
 0x96d   : > { %6376 = shalt.err (!%p6373_p3)
}
 0x96e   : > { %s6377_s12 = scalar_lea.hbm %s7737_s29, 16  ;;  %s6381_s25 = scalar_lea.hbm %s7790_s11, 32 }
 0x96f   : > { %p6378_p4 = scmp.ne.s32.totalorder %s7737_s29, %s6377_s12  ;;  %p6382_p9 = scmp.lt.u32.totalorder %s7737_s29, %s7790_s11 }
 0x970   : > { %p6383_p10 = scmp.lt.u32.totalorder %s6381_s25, %s6377_s12  ;;  %p6385_p12 = scmp.lt.u32.totalorder %s6377_s12, %s7737_s29 }
 0x971   : > { %p6379_p7 = pnand %p6378_p4, %p6540_p5 }
 0x972   : > { %p6384_p11 = por %p6383_p10, %p6382_p9 }
 0x973   : > { %p6380_p8 = pneg %p6379_p7 }
 0x974   : > { %p6386_p13 = por %p6385_p12, %p6384_p11 }
 0x976   : > { %p6387_p0 = pnand %p6386_p13, %p6380_p8 }
 0x978   : > { %6390 = shalt.err (!%p6387_p0)
}
 0x979   : > { %6284 = dma.vmem_to_hbm [thread:$0]  (%p6540_p5), %s7739_s16, 16, %s7737_s29, %s4838_s30  }
 0x97a PF: > { %p6290_p1 = scmp.ge.s32.totalorder %s6425_s20, 2  ;;  %s4862_s0 = sand.u32 1, %s6413_s17  }
 0x97b   : > { %s4863_s24 = scalar_lea.sflag [#allocation3], %s4862_s0 }
 0x97c   : > { %p6287_p2 = pnand %p6290_p1, %p6544_p6 }
 0x97e   : > { %6408 = dma.done.wait (!%p6287_p2), %s4863_s24, 16  }
 0x97f   : > { %6410 = vsyncadd (!%p6287_p2), %s4863_s24, 4294967280  ;;  %p21_p3 = scmp.ge.s32.totalorder %s6527_s23, 4   ;;  %s7854_s17 = smov %s6417_s18 }
 0x980   : > { %s7855_s18 = smov %s6421_s19  ;;  %s7856_s19 = smov %s6538_s26 }
 0x981   : > { %s7857_s20 = smov %s6527_s23  ;;  %23 = sbr.rel (!%p21_p3) target bundleno = 5 (0x5), region = 138 }
 0x988   :  { %4867 = vsyncpa [#allocation3], 1 }
 0x989   :  { %4869 = vsyncpa [#allocation3 + $0x1], 1 }

</bundles_post_ra>
